<compile_context>
chip_gen: v5e
topology: v5e:2x2
jax: 0.10.0
libtpu: 0.0.40
codegen_flags: <defaults>
</compile_context>

<pallas_src>
import math

import jax
import jax.numpy as jnp
from jax import lax
from jax.experimental import pallas as pl
from jax.experimental.pallas import tpu as pltpu

# -----------------------------------------------------------------------------
# Model hyper-parameters (small, synthetic)
# -----------------------------------------------------------------------------
B = 2             # batch
C = 3             # image channels
IMG = 32          # image spatial size
P = 8             # patch size
NP = (IMG // P) ** 2          # 16 visual tokens
T = 8             # text tokens
S = NP + T        # total sequence = 24
D = 32            # hidden size
H = 4             # attention heads
DH = D // H       # head dim = 8
FF = 4 * D        # MLP hidden = 128
V = 128           # vocab size
PD = C * P * P    # flattened patch dim = 192
EPS = 1e-5


# -----------------------------------------------------------------------------
# Fused forward kernel: vision linear -> concat -> decoder block -> LM head.
# One grid step per batch element.
# -----------------------------------------------------------------------------
def _layernorm(x, g, b):
    mu = jnp.mean(x, axis=-1, keepdims=True)
    xc = x - mu
    var = jnp.mean(xc * xc, axis=-1, keepdims=True)
    return xc * lax.rsqrt(var + EPS) * g + b


def _fused_forward_kernel(
    patches_ref, txt_ref, mask_ref,
    wvis_ref, bvis_ref,
    wqkv_ref, wo_ref,
    w1_ref, b1_ref, w2_ref, b2_ref,
    g1_ref, be1_ref, g2_ref, be2_ref,
    wlm_ref, blm_ref,
    o_ref,
    x_scr,
):
    # ---- vision: folded (patch-embed @ visual-projection), bf16 MXU matmul ----
    vis = jnp.dot(patches_ref[0], wvis_ref[...],
                  preferred_element_type=jnp.float32) + bvis_ref[...]     # [NP, D]

    # ---- prepend visual tokens to text embeddings via VMEM scratch ----------
    x_scr[0:NP, :] = vis
    x_scr[NP:S, :] = txt_ref[0]
    x = x_scr[...]                                                        # [S, D] f32

    # ---- self-attention sub-block (pre-LN, fused QKV, causal) ---------------
    h1 = _layernorm(x, g1_ref[...], be1_ref[...])
    qkv = jnp.dot(h1.astype(jnp.bfloat16), wqkv_ref[...],
                  preferred_element_type=jnp.float32)                     # [S, 3D]
    mask = mask_ref[...]                                                  # [S, S] additive

    attn = jnp.zeros((S, D), jnp.float32)
    for h in range(H):                                                    # unrolled, H=4
        qh = qkv[:, h * DH:(h + 1) * DH]                                  # [S, DH]
        kh = qkv[:, D + h * DH:D + (h + 1) * DH]
        vh = qkv[:, 2 * D + h * DH:2 * D + (h + 1) * DH]
        # 1/sqrt(DH) scale is folded into w_q on the host.
        sc = lax.dot_general(qh, kh, (((1,), (1,)), ((), ())),
                             preferred_element_type=jnp.float32)          # [S, S]
        sc = sc + mask
        m = jnp.max(sc, axis=-1, keepdims=True)
        e = jnp.exp(sc - m)
        p = e * pl.reciprocal(jnp.sum(e, axis=-1, keepdims=True), approx=True)
        ctx = jnp.dot(p, vh, preferred_element_type=jnp.float32)          # [S, DH]
        attn = attn + jnp.dot(ctx.astype(jnp.bfloat16), wo_ref[h],
                              preferred_element_type=jnp.float32)         # [S, D]
    x1 = x + attn                                                         # residual

    # ---- MLP sub-block -------------------------------------------------------
    h2 = _layernorm(x1, g2_ref[...], be2_ref[...])
    ff = jnp.dot(h2.astype(jnp.bfloat16), w1_ref[...],
                 preferred_element_type=jnp.float32) + b1_ref[...]
    ff = jax.nn.gelu(ff)
    ff = jnp.dot(ff.astype(jnp.bfloat16), w2_ref[...],
                 preferred_element_type=jnp.float32) + b2_ref[...]
    x2 = x1 + ff                                                          # residual

    # ---- LM head (lane-dense: V = 128) --------------------------------------
    o_ref[0] = (jnp.dot(x2.astype(jnp.bfloat16), wlm_ref[...],
                        preferred_element_type=jnp.float32) + blm_ref[...])


# -----------------------------------------------------------------------------
# Parameter init (deterministic, synthetic)
# -----------------------------------------------------------------------------
def init_params(key):
    ks = jax.random.split(key, 10)
    sd = 0.02
    return {
        # vision patch embedding (== Conv2d(C, D, kernel=P, stride=P) flattened)
        "w_patch": jax.random.normal(ks[0], (PD, D), jnp.float32) * sd,
        "b_patch": jnp.zeros((1, D), jnp.float32),
        # visual projection
        "w_proj": jax.random.normal(ks[1], (D, D), jnp.float32) * sd,
        "b_proj": jnp.zeros((1, D), jnp.float32),
        # text embedding table
        "embed": jax.random.normal(ks[2], (V, D), jnp.float32) * sd,
        # decoder block
        "wq": jax.random.normal(ks[3], (D, D), jnp.float32) * sd,
        "wk": jax.random.normal(ks[4], (D, D), jnp.float32) * sd,
        "wv": jax.random.normal(ks[5], (D, D), jnp.float32) * sd,
        "wo": jax.random.normal(ks[6], (D, D), jnp.float32) * sd,
        "w1": jax.random.normal(ks[7], (D, FF), jnp.float32) * sd,
        "b1": jnp.zeros((1, FF), jnp.float32),
        "w2": jax.random.normal(ks[8], (FF, D), jnp.float32) * sd,
        "b2": jnp.zeros((1, D), jnp.float32),
        "g1": jnp.ones((1, D), jnp.float32),
        "be1": jnp.zeros((1, D), jnp.float32),
        "g2": jnp.ones((1, D), jnp.float32),
        "be2": jnp.zeros((1, D), jnp.float32),
        # LM head
        "w_lm": jax.random.normal(ks[9], (D, V), jnp.float32) * sd,
        "b_lm": jnp.zeros((1, V), jnp.float32),
    }


# -----------------------------------------------------------------------------
# Forward pass: host glue (patchify, weight folding, embedding gather) + one
# fused pallas_call producing logits over the whole sequence.
# -----------------------------------------------------------------------------
def jsvlm_forward(params, image_nchw, text_ids):
    # ---- glue: NCHW image -> flattened patches [B, NP, C*P*P] ----------------
    Hp = Wp = IMG // P
    patches = (
        image_nchw.reshape(B, C, Hp, P, Wp, P)
        .transpose(0, 2, 4, 1, 3, 5)
        .reshape(B, NP, PD)
    )

    # ---- host-side algebraic folding -----------------------------------------
    # patch embed followed by linear projection (no nonlinearity) == one linear
    w_vis = params["w_patch"] @ params["w_proj"]                       # [PD, D]
    b_vis = params["b_patch"] @ params["w_proj"] + params["b_proj"]    # [1, D]
    # fold attention scale into w_q; fuse Q/K/V into one [D, 3D] matmul weight
    scale = 1.0 / math.sqrt(DH)
    w_qkv = jnp.concatenate(
        [params["wq"] * scale, params["wk"], params["wv"]], axis=1)    # [D, 3D]
    # prepack output projection per head so the kernel never transposes heads
    wo_h = params["wo"].reshape(H, DH, D)                              # [H, DH, D]

    # additive causal mask (precomputed once; f32 scores so -1e9 is safe)
    row = lax.broadcasted_iota(jnp.int32, (S, S), 0)
    col = lax.broadcasted_iota(jnp.int32, (S, S), 1)
    mask = jnp.where(col <= row, 0.0, -1e9).astype(jnp.float32)        # [S, S]

    # text embedding lookup (glue gather)
    txt = jnp.take(params["embed"], text_ids, axis=0)                  # [B, T, D]

    bf = lambda a: a.astype(jnp.bfloat16)                              # MXU operands
    full = lambda shp: pl.BlockSpec(shp, lambda b, _s=shp: (0,) * len(_s))

    logits = pl.pallas_call(
        _fused_forward_kernel,
        out_shape=jax.ShapeDtypeStruct((B, S, V), jnp.float32),
        grid=(B,),
        in_specs=[
            pl.BlockSpec((1, NP, PD), lambda b: (b, 0, 0)),   # patches (bf16)
            pl.BlockSpec((1, T, D), lambda b: (b, 0, 0)),     # text embeddings
            full((S, S)),                                     # additive causal mask
            full((PD, D)), full((1, D)),                      # folded vision linear
            full((D, 3 * D)), full((H, DH, D)),               # fused QKV, per-head W_o
            full((D, FF)), full((1, FF)), full((FF, D)), full((1, D)),   # MLP
            full((1, D)), full((1, D)), full((1, D)), full((1, D)),      # LN params
            full((D, V)), full((1, V)),                       # LM head
        ],
        out_specs=pl.BlockSpec((1, S, V), lambda b: (b, 0, 0)),
        scratch_shapes=[pltpu.VMEM((S, D), jnp.float32)],
        compiler_params=pltpu.CompilerParams(
            dimension_semantics=("parallel",)),
    )(
        bf(patches), txt, mask,
        bf(w_vis), b_vis,
        bf(w_qkv), bf(wo_h),
        bf(params["w1"]), params["b1"], bf(params["w2"]), params["b2"],
        params["g1"], params["be1"], params["g2"], params["be2"],
        bf(params["w_lm"]), params["b_lm"],
    )
    return logits


# -----------------------------------------------------------------------------
if __name__ == "__main__":
    key = jax.random.PRNGKey(0)
    k_img, k_ids, k_par = jax.random.split(key, 3)

    image = jax.random.normal(k_img, (B, C, IMG, IMG), jnp.float32)   # NCHW
    text_ids = jax.random.randint(k_ids, (B, T), 0, V, jnp.int32)
    params = init_params(k_par)

    fwd = jax.jit(jsvlm_forward)
    logits = fwd(params, image, text_ids)
    jax.block_until_ready(logits)

    assert logits.shape == (B, S, V)
    assert bool(jnp.all(jnp.isfinite(logits)))
    print("KERNEL_OK")
</pallas_src>

<mosaic_0001>
module attributes {stable_mosaic.version = 11 : i64} {
  func.func @_fused_forward_kernel(%arg0: i32, %arg1: memref<1x16x192xbf16, #tpu.memory_space<vmem>>, %arg2: memref<1x8x32xf32, #tpu.memory_space<vmem>>, %arg3: memref<24x24xf32, #tpu.memory_space<vmem>>, %arg4: memref<192x32xbf16, #tpu.memory_space<vmem>>, %arg5: memref<1x32xf32, #tpu.memory_space<vmem>>, %arg6: memref<32x96xbf16, #tpu.memory_space<vmem>>, %arg7: memref<4x8x32xbf16, #tpu.memory_space<vmem>>, %arg8: memref<32x128xbf16, #tpu.memory_space<vmem>>, %arg9: memref<1x128xf32, #tpu.memory_space<vmem>>, %arg10: memref<128x32xbf16, #tpu.memory_space<vmem>>, %arg11: memref<1x32xf32, #tpu.memory_space<vmem>>, %arg12: memref<1x32xf32, #tpu.memory_space<vmem>>, %arg13: memref<1x32xf32, #tpu.memory_space<vmem>>, %arg14: memref<1x32xf32, #tpu.memory_space<vmem>>, %arg15: memref<1x32xf32, #tpu.memory_space<vmem>>, %arg16: memref<32x128xbf16, #tpu.memory_space<vmem>>, %arg17: memref<1x128xf32, #tpu.memory_space<vmem>>, %arg18: memref<1x24x128xf32, #tpu.memory_space<vmem>>, %arg19: memref<24x32xf32, #tpu.memory_space<vmem>>) attributes {dimension_semantics = [#tpu.dimension_semantics<parallel>], iteration_bounds = array<i64: 2>, scalar_prefetch = 0 : i64, scratch_operands = 1 : i64, tpu.core_type = #tpu.core_type<tc>, window_params = [{transform_indices = @transform_0, window_bounds = array<i64: 1, 16, 192>}, {transform_indices = @transform_1, window_bounds = array<i64: 1, 8, 32>}, {pipeline_mode = #tpu.pipeline_mode<synchronous>, transform_indices = @transform_2, window_bounds = array<i64: 24, 24>}, {pipeline_mode = #tpu.pipeline_mode<synchronous>, transform_indices = @transform_3, window_bounds = array<i64: 192, 32>}, {pipeline_mode = #tpu.pipeline_mode<synchronous>, transform_indices = @transform_4, window_bounds = array<i64: 1, 32>}, {pipeline_mode = #tpu.pipeline_mode<synchronous>, transform_indices = @transform_5, window_bounds = array<i64: 32, 96>}, {pipeline_mode = #tpu.pipeline_mode<synchronous>, transform_indices = @transform_6, window_bounds = array<i64: 4, 8, 32>}, {pipeline_mode = #tpu.pipeline_mode<synchronous>, transform_indices = @transform_7, window_bounds = array<i64: 32, 128>}, {pipeline_mode = #tpu.pipeline_mode<synchronous>, transform_indices = @transform_8, window_bounds = array<i64: 1, 128>}, {pipeline_mode = #tpu.pipeline_mode<synchronous>, transform_indices = @transform_9, window_bounds = array<i64: 128, 32>}, {pipeline_mode = #tpu.pipeline_mode<synchronous>, transform_indices = @transform_10, window_bounds = array<i64: 1, 32>}, {pipeline_mode = #tpu.pipeline_mode<synchronous>, transform_indices = @transform_11, window_bounds = array<i64: 1, 32>}, {pipeline_mode = #tpu.pipeline_mode<synchronous>, transform_indices = @transform_12, window_bounds = array<i64: 1, 32>}, {pipeline_mode = #tpu.pipeline_mode<synchronous>, transform_indices = @transform_13, window_bounds = array<i64: 1, 32>}, {pipeline_mode = #tpu.pipeline_mode<synchronous>, transform_indices = @transform_14, window_bounds = array<i64: 1, 32>}, {pipeline_mode = #tpu.pipeline_mode<synchronous>, transform_indices = @transform_15, window_bounds = array<i64: 32, 128>}, {pipeline_mode = #tpu.pipeline_mode<synchronous>, transform_indices = @transform_16, window_bounds = array<i64: 1, 128>}, {transform_indices = @transform_17, window_bounds = array<i64: 1, 24, 128>}]} {
    %c0 = arith.constant 0 : index
    %c0_0 = arith.constant 0 : index
    %c0_1 = arith.constant 0 : index
    %0 = vector.load %arg1[%c0, %c0_0, %c0_1] : memref<1x16x192xbf16, #tpu.memory_space<vmem>>, vector<1x16x192xbf16>
    %1 = vector.shape_cast %0 : vector<1x16x192xbf16> to vector<16x192xbf16>
    %c0_2 = arith.constant 0 : index
    %c0_3 = arith.constant 0 : index
    %2 = vector.load %arg4[%c0_2, %c0_3] : memref<192x32xbf16, #tpu.memory_space<vmem>>, vector<192x32xbf16>
    %cst = arith.constant dense<0.000000e+00> : vector<16x32xf32>
    %3 = tpu.matmul %1, %2, %cst {dimension_numbers = #tpu.dot_dimension_numbers<[1], [0], [0], [1], [0, 0, 1, 1], [], []>} : vector<16x192xbf16>, vector<192x32xbf16>, vector<16x32xf32> -> vector<16x32xf32>
    %c0_4 = arith.constant 0 : index
    %c0_5 = arith.constant 0 : index
    %4 = vector.load %arg5[%c0_4, %c0_5] : memref<1x32xf32, #tpu.memory_space<vmem>>, vector<1x32xf32>
    %5 = vector.broadcast %4 : vector<1x32xf32> to vector<16x32xf32>
    %6 = arith.addf %3, %5 : vector<16x32xf32>
    %c0_6 = arith.constant 0 : index
    %c0_7 = arith.constant 0 : index
    %7 = vector.load %arg19[%c0_6, %c0_7] : memref<24x32xf32, #tpu.memory_space<vmem>>, vector<16x32xf32>
    tpu.vector_store %arg19[%c0_6, %c0_7], %6 {strides = array<i32>} : memref<24x32xf32, #tpu.memory_space<vmem>>, vector<16x32xf32>,
    %c0_8 = arith.constant 0 : index
    %c0_9 = arith.constant 0 : index
    %c0_10 = arith.constant 0 : index
    %8 = vector.load %arg2[%c0_8, %c0_9, %c0_10] : memref<1x8x32xf32, #tpu.memory_space<vmem>>, vector<1x8x32xf32>
    %9 = vector.shape_cast %8 : vector<1x8x32xf32> to vector<8x32xf32>
    %c16 = arith.constant 16 : index
    %c0_11 = arith.constant 0 : index
    %10 = vector.load %arg19[%c16, %c0_11] : memref<24x32xf32, #tpu.memory_space<vmem>>, vector<8x32xf32>
    tpu.vector_store %arg19[%c16, %c0_11], %9 {strides = array<i32>} : memref<24x32xf32, #tpu.memory_space<vmem>>, vector<8x32xf32>,
    %c0_12 = arith.constant 0 : index
    %c0_13 = arith.constant 0 : index
    %11 = vector.load %arg19[%c0_12, %c0_13] : memref<24x32xf32, #tpu.memory_space<vmem>>, vector<24x32xf32>
    %c0_14 = arith.constant 0 : index
    %c0_15 = arith.constant 0 : index
    %12 = vector.load %arg12[%c0_14, %c0_15] : memref<1x32xf32, #tpu.memory_space<vmem>>, vector<1x32xf32>
    %c0_16 = arith.constant 0 : index
    %c0_17 = arith.constant 0 : index
    %13 = vector.load %arg13[%c0_16, %c0_17] : memref<1x32xf32, #tpu.memory_space<vmem>>, vector<1x32xf32>
    %cst_18 = arith.constant dense<0.000000e+00> : vector<24xf32>
    %14 = vector.multi_reduction <add>, %11, %cst_18 [1] : vector<24x32xf32> to vector<24xf32>
    %15 = vector.shape_cast %14 : vector<24xf32> to vector<24x1xf32>
    %cst_19 = arith.constant 3.200000e+01 : f32
    %16 = vector.broadcast %cst_19 : f32 to vector<24x1xf32>
    %17 = arith.divf %15, %16 : vector<24x1xf32>
    %18 = vector.broadcast %17 : vector<24x1xf32> to vector<24x32xf32>
    %19 = arith.subf %11, %18 : vector<24x32xf32>
    %20 = arith.mulf %19, %19 : vector<24x32xf32>
    %cst_20 = arith.constant dense<0.000000e+00> : vector<24xf32>
    %21 = vector.multi_reduction <add>, %20, %cst_20 [1] : vector<24x32xf32> to vector<24xf32>
    %22 = vector.shape_cast %21 : vector<24xf32> to vector<24x1xf32>
    %cst_21 = arith.constant 3.200000e+01 : f32
    %23 = vector.broadcast %cst_21 : f32 to vector<24x1xf32>
    %24 = arith.divf %22, %23 : vector<24x1xf32>
    %cst_22 = arith.constant 9.99999974E-6 : f32
    %25 = vector.broadcast %cst_22 : f32 to vector<24x1xf32>
    %26 = arith.addf %24, %25 : vector<24x1xf32>
    %27 = math.rsqrt %26 : vector<24x1xf32>
    %28 = vector.broadcast %27 : vector<24x1xf32> to vector<24x32xf32>
    %29 = arith.mulf %19, %28 : vector<24x32xf32>
    %30 = vector.broadcast %12 : vector<1x32xf32> to vector<24x32xf32>
    %31 = arith.mulf %29, %30 : vector<24x32xf32>
    %32 = vector.broadcast %13 : vector<1x32xf32> to vector<24x32xf32>
    %33 = arith.addf %31, %32 : vector<24x32xf32>
    %34 = arith.truncf %33 : vector<24x32xf32> to vector<24x32xbf16>
    %c0_23 = arith.constant 0 : index
    %c0_24 = arith.constant 0 : index
    %35 = vector.load %arg6[%c0_23, %c0_24] : memref<32x96xbf16, #tpu.memory_space<vmem>>, vector<32x96xbf16>
    %cst_25 = arith.constant dense<0.000000e+00> : vector<24x96xf32>
    %36 = tpu.matmul %34, %35, %cst_25 {dimension_numbers = #tpu.dot_dimension_numbers<[1], [0], [0], [1], [0, 0, 1, 1], [], []>} : vector<24x32xbf16>, vector<32x96xbf16>, vector<24x96xf32> -> vector<24x96xf32>
    %c0_26 = arith.constant 0 : index
    %c0_27 = arith.constant 0 : index
    %37 = vector.load %arg3[%c0_26, %c0_27] : memref<24x24xf32, #tpu.memory_space<vmem>>, vector<24x24xf32>
    %cst_28 = arith.constant 0.000000e+00 : f32
    %38 = vector.broadcast %cst_28 : f32 to vector<24x32xf32>
    %39 = vector.extract_strided_slice %36 {offsets = [0, 0], sizes = [24, 8], strides = [1, 1]} : vector<24x96xf32> to vector<24x8xf32>
    %40 = vector.extract_strided_slice %36 {offsets = [0, 32], sizes = [24, 8], strides = [1, 1]} : vector<24x96xf32> to vector<24x8xf32>
    %41 = vector.extract_strided_slice %36 {offsets = [0, 64], sizes = [24, 8], strides = [1, 1]} : vector<24x96xf32> to vector<24x8xf32>
    %cst_29 = arith.constant dense<0.000000e+00> : vector<24x24xf32>
    %42 = tpu.matmul %39, %40, %cst_29 {dimension_numbers = #tpu.dot_dimension_numbers<[1], [1], [0], [0], [0, 0, 1, 0], [], []>} : vector<24x8xf32>, vector<24x8xf32>, vector<24x24xf32> -> vector<24x24xf32>
    %43 = arith.addf %42, %37 : vector<24x24xf32>
    %cst_30 = arith.constant dense<0xFF800000> : vector<24xf32>
    %44 = vector.multi_reduction <maximumf>, %43, %cst_30 [1] : vector<24x24xf32> to vector<24xf32>
    %45 = vector.shape_cast %44 : vector<24xf32> to vector<24x1xf32>
    %46 = vector.broadcast %45 : vector<24x1xf32> to vector<24x24xf32>
    %47 = arith.subf %43, %46 : vector<24x24xf32>
    %48 = math.exp %47 : vector<24x24xf32>
    %cst_31 = arith.constant dense<0.000000e+00> : vector<24xf32>
    %49 = vector.multi_reduction <add>, %48, %cst_31 [1] : vector<24x24xf32> to vector<24xf32>
    %50 = vector.shape_cast %49 : vector<24xf32> to vector<24x1xf32>
    %51 = tpu.reciprocal %50 {approx = true} : vector<24x1xf32> -> vector<24x1xf32>
    %52 = vector.broadcast %51 : vector<24x1xf32> to vector<24x24xf32>
    %53 = arith.mulf %48, %52 : vector<24x24xf32>
    %cst_32 = arith.constant dense<0.000000e+00> : vector<24x8xf32>
    %54 = tpu.matmul %53, %41, %cst_32 {dimension_numbers = #tpu.dot_dimension_numbers<[1], [0], [0], [1], [0, 0, 1, 1], [], []>} : vector<24x24xf32>, vector<24x8xf32>, vector<24x8xf32> -> vector<24x8xf32>
    %55 = arith.truncf %54 : vector<24x8xf32> to vector<24x8xbf16>
    %c0_33 = arith.constant 0 : index
    %c0_34 = arith.constant 0 : index
    %c0_35 = arith.constant 0 : index
    %56 = vector.load %arg7[%c0_33, %c0_34, %c0_35] : memref<4x8x32xbf16, #tpu.memory_space<vmem>>, vector<1x8x32xbf16>
    %57 = vector.shape_cast %56 : vector<1x8x32xbf16> to vector<8x32xbf16>
    %cst_36 = arith.constant dense<0.000000e+00> : vector<24x32xf32>
    %58 = tpu.matmul %55, %57, %cst_36 {dimension_numbers = #tpu.dot_dimension_numbers<[1], [0], [0], [1], [0, 0, 1, 1], [], []>} : vector<24x8xbf16>, vector<8x32xbf16>, vector<24x32xf32> -> vector<24x32xf32>
    %59 = arith.addf %38, %58 : vector<24x32xf32>
    %60 = vector.extract_strided_slice %36 {offsets = [0, 8], sizes = [24, 8], strides = [1, 1]} : vector<24x96xf32> to vector<24x8xf32>
    %61 = vector.extract_strided_slice %36 {offsets = [0, 40], sizes = [24, 8], strides = [1, 1]} : vector<24x96xf32> to vector<24x8xf32>
    %62 = vector.extract_strided_slice %36 {offsets = [0, 72], sizes = [24, 8], strides = [1, 1]} : vector<24x96xf32> to vector<24x8xf32>
    %cst_37 = arith.constant dense<0.000000e+00> : vector<24x24xf32>
    %63 = tpu.matmul %60, %61, %cst_37 {dimension_numbers = #tpu.dot_dimension_numbers<[1], [1], [0], [0], [0, 0, 1, 0], [], []>} : vector<24x8xf32>, vector<24x8xf32>, vector<24x24xf32> -> vector<24x24xf32>
    %64 = arith.addf %63, %37 : vector<24x24xf32>
    %cst_38 = arith.constant dense<0xFF800000> : vector<24xf32>
    %65 = vector.multi_reduction <maximumf>, %64, %cst_38 [1] : vector<24x24xf32> to vector<24xf32>
    %66 = vector.shape_cast %65 : vector<24xf32> to vector<24x1xf32>
    %67 = vector.broadcast %66 : vector<24x1xf32> to vector<24x24xf32>
    %68 = arith.subf %64, %67 : vector<24x24xf32>
    %69 = math.exp %68 : vector<24x24xf32>
    %cst_39 = arith.constant dense<0.000000e+00> : vector<24xf32>
    %70 = vector.multi_reduction <add>, %69, %cst_39 [1] : vector<24x24xf32> to vector<24xf32>
    %71 = vector.shape_cast %70 : vector<24xf32> to vector<24x1xf32>
    %72 = tpu.reciprocal %71 {approx = true} : vector<24x1xf32> -> vector<24x1xf32>
    %73 = vector.broadcast %72 : vector<24x1xf32> to vector<24x24xf32>
    %74 = arith.mulf %69, %73 : vector<24x24xf32>
    %cst_40 = arith.constant dense<0.000000e+00> : vector<24x8xf32>
    %75 = tpu.matmul %74, %62, %cst_40 {dimension_numbers = #tpu.dot_dimension_numbers<[1], [0], [0], [1], [0, 0, 1, 1], [], []>} : vector<24x24xf32>, vector<24x8xf32>, vector<24x8xf32> -> vector<24x8xf32>
    %76 = arith.truncf %75 : vector<24x8xf32> to vector<24x8xbf16>
    %c1 = arith.constant 1 : index
    %c0_41 = arith.constant 0 : index
    %c0_42 = arith.constant 0 : index
    %77 = vector.load %arg7[%c1, %c0_41, %c0_42] : memref<4x8x32xbf16, #tpu.memory_space<vmem>>, vector<1x8x32xbf16>
    %78 = vector.shape_cast %77 : vector<1x8x32xbf16> to vector<8x32xbf16>
    %cst_43 = arith.constant dense<0.000000e+00> : vector<24x32xf32>
    %79 = tpu.matmul %76, %78, %cst_43 {dimension_numbers = #tpu.dot_dimension_numbers<[1], [0], [0], [1], [0, 0, 1, 1], [], []>} : vector<24x8xbf16>, vector<8x32xbf16>, vector<24x32xf32> -> vector<24x32xf32>
    %80 = arith.addf %59, %79 : vector<24x32xf32>
    %81 = vector.extract_strided_slice %36 {offsets = [0, 16], sizes = [24, 8], strides = [1, 1]} : vector<24x96xf32> to vector<24x8xf32>
    %82 = vector.extract_strided_slice %36 {offsets = [0, 48], sizes = [24, 8], strides = [1, 1]} : vector<24x96xf32> to vector<24x8xf32>
    %83 = vector.extract_strided_slice %36 {offsets = [0, 80], sizes = [24, 8], strides = [1, 1]} : vector<24x96xf32> to vector<24x8xf32>
    %cst_44 = arith.constant dense<0.000000e+00> : vector<24x24xf32>
    %84 = tpu.matmul %81, %82, %cst_44 {dimension_numbers = #tpu.dot_dimension_numbers<[1], [1], [0], [0], [0, 0, 1, 0], [], []>} : vector<24x8xf32>, vector<24x8xf32>, vector<24x24xf32> -> vector<24x24xf32>
    %85 = arith.addf %84, %37 : vector<24x24xf32>
    %cst_45 = arith.constant dense<0xFF800000> : vector<24xf32>
    %86 = vector.multi_reduction <maximumf>, %85, %cst_45 [1] : vector<24x24xf32> to vector<24xf32>
    %87 = vector.shape_cast %86 : vector<24xf32> to vector<24x1xf32>
    %88 = vector.broadcast %87 : vector<24x1xf32> to vector<24x24xf32>
    %89 = arith.subf %85, %88 : vector<24x24xf32>
    %90 = math.exp %89 : vector<24x24xf32>
    %cst_46 = arith.constant dense<0.000000e+00> : vector<24xf32>
    %91 = vector.multi_reduction <add>, %90, %cst_46 [1] : vector<24x24xf32> to vector<24xf32>
    %92 = vector.shape_cast %91 : vector<24xf32> to vector<24x1xf32>
    %93 = tpu.reciprocal %92 {approx = true} : vector<24x1xf32> -> vector<24x1xf32>
    %94 = vector.broadcast %93 : vector<24x1xf32> to vector<24x24xf32>
    %95 = arith.mulf %90, %94 : vector<24x24xf32>
    %cst_47 = arith.constant dense<0.000000e+00> : vector<24x8xf32>
    %96 = tpu.matmul %95, %83, %cst_47 {dimension_numbers = #tpu.dot_dimension_numbers<[1], [0], [0], [1], [0, 0, 1, 1], [], []>} : vector<24x24xf32>, vector<24x8xf32>, vector<24x8xf32> -> vector<24x8xf32>
    %97 = arith.truncf %96 : vector<24x8xf32> to vector<24x8xbf16>
    %c2 = arith.constant 2 : index
    %c0_48 = arith.constant 0 : index
    %c0_49 = arith.constant 0 : index
    %98 = vector.load %arg7[%c2, %c0_48, %c0_49] : memref<4x8x32xbf16, #tpu.memory_space<vmem>>, vector<1x8x32xbf16>
    %99 = vector.shape_cast %98 : vector<1x8x32xbf16> to vector<8x32xbf16>
    %cst_50 = arith.constant dense<0.000000e+00> : vector<24x32xf32>
    %100 = tpu.matmul %97, %99, %cst_50 {dimension_numbers = #tpu.dot_dimension_numbers<[1], [0], [0], [1], [0, 0, 1, 1], [], []>} : vector<24x8xbf16>, vector<8x32xbf16>, vector<24x32xf32> -> vector<24x32xf32>
    %101 = arith.addf %80, %100 : vector<24x32xf32>
    %102 = vector.extract_strided_slice %36 {offsets = [0, 24], sizes = [24, 8], strides = [1, 1]} : vector<24x96xf32> to vector<24x8xf32>
    %103 = vector.extract_strided_slice %36 {offsets = [0, 56], sizes = [24, 8], strides = [1, 1]} : vector<24x96xf32> to vector<24x8xf32>
    %104 = vector.extract_strided_slice %36 {offsets = [0, 88], sizes = [24, 8], strides = [1, 1]} : vector<24x96xf32> to vector<24x8xf32>
    %cst_51 = arith.constant dense<0.000000e+00> : vector<24x24xf32>
    %105 = tpu.matmul %102, %103, %cst_51 {dimension_numbers = #tpu.dot_dimension_numbers<[1], [1], [0], [0], [0, 0, 1, 0], [], []>} : vector<24x8xf32>, vector<24x8xf32>, vector<24x24xf32> -> vector<24x24xf32>
    %106 = arith.addf %105, %37 : vector<24x24xf32>
    %cst_52 = arith.constant dense<0xFF800000> : vector<24xf32>
    %107 = vector.multi_reduction <maximumf>, %106, %cst_52 [1] : vector<24x24xf32> to vector<24xf32>
    %108 = vector.shape_cast %107 : vector<24xf32> to vector<24x1xf32>
    %109 = vector.broadcast %108 : vector<24x1xf32> to vector<24x24xf32>
    %110 = arith.subf %106, %109 : vector<24x24xf32>
    %111 = math.exp %110 : vector<24x24xf32>
    %cst_53 = arith.constant dense<0.000000e+00> : vector<24xf32>
    %112 = vector.multi_reduction <add>, %111, %cst_53 [1] : vector<24x24xf32> to vector<24xf32>
    %113 = vector.shape_cast %112 : vector<24xf32> to vector<24x1xf32>
    %114 = tpu.reciprocal %113 {approx = true} : vector<24x1xf32> -> vector<24x1xf32>
    %115 = vector.broadcast %114 : vector<24x1xf32> to vector<24x24xf32>
    %116 = arith.mulf %111, %115 : vector<24x24xf32>
    %cst_54 = arith.constant dense<0.000000e+00> : vector<24x8xf32>
    %117 = tpu.matmul %116, %104, %cst_54 {dimension_numbers = #tpu.dot_dimension_numbers<[1], [0], [0], [1], [0, 0, 1, 1], [], []>} : vector<24x24xf32>, vector<24x8xf32>, vector<24x8xf32> -> vector<24x8xf32>
    %118 = arith.truncf %117 : vector<24x8xf32> to vector<24x8xbf16>
    %c3 = arith.constant 3 : index
    %c0_55 = arith.constant 0 : index
    %c0_56 = arith.constant 0 : index
    %119 = vector.load %arg7[%c3, %c0_55, %c0_56] : memref<4x8x32xbf16, #tpu.memory_space<vmem>>, vector<1x8x32xbf16>
    %120 = vector.shape_cast %119 : vector<1x8x32xbf16> to vector<8x32xbf16>
    %cst_57 = arith.constant dense<0.000000e+00> : vector<24x32xf32>
    %121 = tpu.matmul %118, %120, %cst_57 {dimension_numbers = #tpu.dot_dimension_numbers<[1], [0], [0], [1], [0, 0, 1, 1], [], []>} : vector<24x8xbf16>, vector<8x32xbf16>, vector<24x32xf32> -> vector<24x32xf32>
    %122 = arith.addf %101, %121 : vector<24x32xf32>
    %123 = arith.addf %11, %122 : vector<24x32xf32>
    %c0_58 = arith.constant 0 : index
    %c0_59 = arith.constant 0 : index
    %124 = vector.load %arg14[%c0_58, %c0_59] : memref<1x32xf32, #tpu.memory_space<vmem>>, vector<1x32xf32>
    %c0_60 = arith.constant 0 : index
    %c0_61 = arith.constant 0 : index
    %125 = vector.load %arg15[%c0_60, %c0_61] : memref<1x32xf32, #tpu.memory_space<vmem>>, vector<1x32xf32>
    %cst_62 = arith.constant dense<0.000000e+00> : vector<24xf32>
    %126 = vector.multi_reduction <add>, %123, %cst_62 [1] : vector<24x32xf32> to vector<24xf32>
    %127 = vector.shape_cast %126 : vector<24xf32> to vector<24x1xf32>
    %cst_63 = arith.constant 3.200000e+01 : f32
    %128 = vector.broadcast %cst_63 : f32 to vector<24x1xf32>
    %129 = arith.divf %127, %128 : vector<24x1xf32>
    %130 = vector.broadcast %129 : vector<24x1xf32> to vector<24x32xf32>
    %131 = arith.subf %123, %130 : vector<24x32xf32>
    %132 = arith.mulf %131, %131 : vector<24x32xf32>
    %cst_64 = arith.constant dense<0.000000e+00> : vector<24xf32>
    %133 = vector.multi_reduction <add>, %132, %cst_64 [1] : vector<24x32xf32> to vector<24xf32>
    %134 = vector.shape_cast %133 : vector<24xf32> to vector<24x1xf32>
    %cst_65 = arith.constant 3.200000e+01 : f32
    %135 = vector.broadcast %cst_65 : f32 to vector<24x1xf32>
    %136 = arith.divf %134, %135 : vector<24x1xf32>
    %cst_66 = arith.constant 9.99999974E-6 : f32
    %137 = vector.broadcast %cst_66 : f32 to vector<24x1xf32>
    %138 = arith.addf %136, %137 : vector<24x1xf32>
    %139 = math.rsqrt %138 : vector<24x1xf32>
    %140 = vector.broadcast %139 : vector<24x1xf32> to vector<24x32xf32>
    %141 = arith.mulf %131, %140 : vector<24x32xf32>
    %142 = vector.broadcast %124 : vector<1x32xf32> to vector<24x32xf32>
    %143 = arith.mulf %141, %142 : vector<24x32xf32>
    %144 = vector.broadcast %125 : vector<1x32xf32> to vector<24x32xf32>
    %145 = arith.addf %143, %144 : vector<24x32xf32>
    %146 = arith.truncf %145 : vector<24x32xf32> to vector<24x32xbf16>
    %c0_67 = arith.constant 0 : index
    %c0_68 = arith.constant 0 : index
    %147 = vector.load %arg8[%c0_67, %c0_68] : memref<32x128xbf16, #tpu.memory_space<vmem>>, vector<32x128xbf16>
    %cst_69 = arith.constant dense<0.000000e+00> : vector<24x128xf32>
    %148 = tpu.matmul %146, %147, %cst_69 {dimension_numbers = #tpu.dot_dimension_numbers<[1], [0], [0], [1], [0, 0, 1, 1], [], []>} : vector<24x32xbf16>, vector<32x128xbf16>, vector<24x128xf32> -> vector<24x128xf32>
    %c0_70 = arith.constant 0 : index
    %c0_71 = arith.constant 0 : index
    %149 = vector.load %arg9[%c0_70, %c0_71] : memref<1x128xf32, #tpu.memory_space<vmem>>, vector<1x128xf32>
    %150 = vector.broadcast %149 : vector<1x128xf32> to vector<24x128xf32>
    %151 = arith.addf %148, %150 : vector<24x128xf32>
    %152 = arith.mulf %151, %151 : vector<24x128xf32>
    %153 = arith.mulf %151, %152 : vector<24x128xf32>
    %cst_72 = arith.constant 4.471500e-02 : f32
    %154 = vector.broadcast %cst_72 : f32 to vector<24x128xf32>
    %155 = arith.mulf %154, %153 : vector<24x128xf32>
    %156 = arith.addf %151, %155 : vector<24x128xf32>
    %cst_73 = arith.constant 0.797884583 : f32
    %157 = vector.broadcast %cst_73 : f32 to vector<24x128xf32>
    %158 = arith.mulf %157, %156 : vector<24x128xf32>
    %159 = math.tanh %158 : vector<24x128xf32>
    %cst_74 = arith.constant 1.000000e+00 : f32
    %160 = vector.broadcast %cst_74 : f32 to vector<24x128xf32>
    %161 = arith.addf %160, %159 : vector<24x128xf32>
    %cst_75 = arith.constant 5.000000e-01 : f32
    %162 = vector.broadcast %cst_75 : f32 to vector<24x128xf32>
    %163 = arith.mulf %162, %161 : vector<24x128xf32>
    %164 = arith.mulf %151, %163 : vector<24x128xf32>
    %165 = arith.truncf %164 : vector<24x128xf32> to vector<24x128xbf16>
    %c0_76 = arith.constant 0 : index
    %c0_77 = arith.constant 0 : index
    %166 = vector.load %arg10[%c0_76, %c0_77] : memref<128x32xbf16, #tpu.memory_space<vmem>>, vector<128x32xbf16>
    %cst_78 = arith.constant dense<0.000000e+00> : vector<24x32xf32>
    %167 = tpu.matmul %165, %166, %cst_78 {dimension_numbers = #tpu.dot_dimension_numbers<[1], [0], [0], [1], [0, 0, 1, 1], [], []>} : vector<24x128xbf16>, vector<128x32xbf16>, vector<24x32xf32> -> vector<24x32xf32>
    %c0_79 = arith.constant 0 : index
    %c0_80 = arith.constant 0 : index
    %168 = vector.load %arg11[%c0_79, %c0_80] : memref<1x32xf32, #tpu.memory_space<vmem>>, vector<1x32xf32>
    %169 = vector.broadcast %168 : vector<1x32xf32> to vector<24x32xf32>
    %170 = arith.addf %167, %169 : vector<24x32xf32>
    %171 = arith.addf %123, %170 : vector<24x32xf32>
    %172 = arith.truncf %171 : vector<24x32xf32> to vector<24x32xbf16>
    %c0_81 = arith.constant 0 : index
    %c0_82 = arith.constant 0 : index
    %173 = vector.load %arg16[%c0_81, %c0_82] : memref<32x128xbf16, #tpu.memory_space<vmem>>, vector<32x128xbf16>
    %cst_83 = arith.constant dense<0.000000e+00> : vector<24x128xf32>
    %174 = tpu.matmul %172, %173, %cst_83 {dimension_numbers = #tpu.dot_dimension_numbers<[1], [0], [0], [1], [0, 0, 1, 1], [], []>} : vector<24x32xbf16>, vector<32x128xbf16>, vector<24x128xf32> -> vector<24x128xf32>
    %c0_84 = arith.constant 0 : index
    %c0_85 = arith.constant 0 : index
    %175 = vector.load %arg17[%c0_84, %c0_85] : memref<1x128xf32, #tpu.memory_space<vmem>>, vector<1x128xf32>
    %176 = vector.broadcast %175 : vector<1x128xf32> to vector<24x128xf32>
    %177 = arith.addf %174, %176 : vector<24x128xf32>
    %c0_86 = arith.constant 0 : index
    %c0_87 = arith.constant 0 : index
    %c0_88 = arith.constant 0 : index
    %178 = vector.load %arg18[%c0_86, %c0_87, %c0_88] : memref<1x24x128xf32, #tpu.memory_space<vmem>>, vector<1x24x128xf32>
    %179 = vector.shape_cast %178 : vector<1x24x128xf32> to vector<24x128xf32>
    %180 = vector.shape_cast %177 : vector<24x128xf32> to vector<1x24x128xf32>
    tpu.vector_store %arg18[%c0_86, %c0_87, %c0_88], %180 {strides = array<i32>} : memref<1x24x128xf32, #tpu.memory_space<vmem>>, vector<1x24x128xf32>,
    return
  }
  func.func @transform_0(%arg0: i32) -> (i32, i32, i32) {
    %c0_i32 = arith.constant 0 : i32
    %c0_i32_0 = arith.constant 0 : i32
    %c0_i32_1 = arith.constant 0 : i32
    return %arg0, %c0_i32, %c0_i32_0 : i32, i32, i32
  }
  func.func @transform_1(%arg0: i32) -> (i32, i32, i32) {
    %c0_i32 = arith.constant 0 : i32
    %c0_i32_0 = arith.constant 0 : i32
    %c0_i32_1 = arith.constant 0 : i32
    return %arg0, %c0_i32, %c0_i32_0 : i32, i32, i32
  }
  func.func @transform_2(%arg0: i32) -> (i32, i32) {
    %c0_i32 = arith.constant 0 : i32
    %c0_i32_0 = arith.constant 0 : i32
    %c0_i32_1 = arith.constant 0 : i32
    return %c0_i32, %c0_i32_0 : i32, i32
  }
  func.func @transform_3(%arg0: i32) -> (i32, i32) {
    %c0_i32 = arith.constant 0 : i32
    %c0_i32_0 = arith.constant 0 : i32
    %c0_i32_1 = arith.constant 0 : i32
    return %c0_i32, %c0_i32_0 : i32, i32
  }
  func.func @transform_4(%arg0: i32) -> (i32, i32) {
    %c0_i32 = arith.constant 0 : i32
    %c0_i32_0 = arith.constant 0 : i32
    %c0_i32_1 = arith.constant 0 : i32
    return %c0_i32, %c0_i32_0 : i32, i32
  }
  func.func @transform_5(%arg0: i32) -> (i32, i32) {
    %c0_i32 = arith.constant 0 : i32
    %c0_i32_0 = arith.constant 0 : i32
    %c0_i32_1 = arith.constant 0 : i32
    return %c0_i32, %c0_i32_0 : i32, i32
  }
  func.func @transform_6(%arg0: i32) -> (i32, i32, i32) {
    %c0_i32 = arith.constant 0 : i32
    %c0_i32_0 = arith.constant 0 : i32
    %c0_i32_1 = arith.constant 0 : i32
    %c0_i32_2 = arith.constant 0 : i32
    return %c0_i32, %c0_i32_0, %c0_i32_1 : i32, i32, i32
  }
  func.func @transform_7(%arg0: i32) -> (i32, i32) {
    %c0_i32 = arith.constant 0 : i32
    %c0_i32_0 = arith.constant 0 : i32
    %c0_i32_1 = arith.constant 0 : i32
    return %c0_i32, %c0_i32_0 : i32, i32
  }
  func.func @transform_8(%arg0: i32) -> (i32, i32) {
    %c0_i32 = arith.constant 0 : i32
    %c0_i32_0 = arith.constant 0 : i32
    %c0_i32_1 = arith.constant 0 : i32
    return %c0_i32, %c0_i32_0 : i32, i32
  }
  func.func @transform_9(%arg0: i32) -> (i32, i32) {
    %c0_i32 = arith.constant 0 : i32
    %c0_i32_0 = arith.constant 0 : i32
    %c0_i32_1 = arith.constant 0 : i32
    return %c0_i32, %c0_i32_0 : i32, i32
  }
  func.func @transform_10(%arg0: i32) -> (i32, i32) {
    %c0_i32 = arith.constant 0 : i32
    %c0_i32_0 = arith.constant 0 : i32
    %c0_i32_1 = arith.constant 0 : i32
    return %c0_i32, %c0_i32_0 : i32, i32
  }
  func.func @transform_11(%arg0: i32) -> (i32, i32) {
    %c0_i32 = arith.constant 0 : i32
    %c0_i32_0 = arith.constant 0 : i32
    %c0_i32_1 = arith.constant 0 : i32
    return %c0_i32, %c0_i32_0 : i32, i32
  }
  func.func @transform_12(%arg0: i32) -> (i32, i32) {
    %c0_i32 = arith.constant 0 : i32
    %c0_i32_0 = arith.constant 0 : i32
    %c0_i32_1 = arith.constant 0 : i32
    return %c0_i32, %c0_i32_0 : i32, i32
  }
  func.func @transform_13(%arg0: i32) -> (i32, i32) {
    %c0_i32 = arith.constant 0 : i32
    %c0_i32_0 = arith.constant 0 : i32
    %c0_i32_1 = arith.constant 0 : i32
    return %c0_i32, %c0_i32_0 : i32, i32
  }
  func.func @transform_14(%arg0: i32) -> (i32, i32) {
    %c0_i32 = arith.constant 0 : i32
    %c0_i32_0 = arith.constant 0 : i32
    %c0_i32_1 = arith.constant 0 : i32
    return %c0_i32, %c0_i32_0 : i32, i32
  }
  func.func @transform_15(%arg0: i32) -> (i32, i32) {
    %c0_i32 = arith.constant 0 : i32
    %c0_i32_0 = arith.constant 0 : i32
    %c0_i32_1 = arith.constant 0 : i32
    return %c0_i32, %c0_i32_0 : i32, i32
  }
  func.func @transform_16(%arg0: i32) -> (i32, i32) {
    %c0_i32 = arith.constant 0 : i32
    %c0_i32_0 = arith.constant 0 : i32
    %c0_i32_1 = arith.constant 0 : i32
    return %c0_i32, %c0_i32_0 : i32, i32
  }
  func.func @transform_17(%arg0: i32) -> (i32, i32, i32) {
    %c0_i32 = arith.constant 0 : i32
    %c0_i32_0 = arith.constant 0 : i32
    %c0_i32_1 = arith.constant 0 : i32
    return %arg0, %c0_i32, %c0_i32_0 : i32, i32, i32
  }
}

</mosaic_0001>

<bundles_post_ra>
// kernel: jsvlm_forward.1
= control target key start
LH: loop header
LB: loop body
LE: loop exit
PB: predicated region body
PF: predicated region fallthrough
CT: control target
= control target key end

     0   :  { %s2870_s0 = inlined_call_operand.vmem [shape: bf16[2,16,192], index: 0, kind: input, shape index: {}]   ;;  %s2871_s1 = inlined_call_operand.vmem [shape: f32[2,8,32], index: 1, kind: input, shape index: {}]   ;;  %s2872_s2 = inlined_call_operand.vmem [shape: f32[24,24], index: 2, kind: input, shape index: {}]   ;;  %s2873_s3 = inlined_call_operand.vmem [shape: bf16[192,32], index: 3, kind: input, shape index: {}]   ;;  %s2874_s4 = inlined_call_operand.vmem [shape: f32[1,32], index: 4, kind: input, shape index: {}]   ;;  %s2875_s5 = inlined_call_operand.vmem [shape: bf16[32,96], index: 5, kind: input, shape index: {}]   ;;  %s2876_s6 = inlined_call_operand.vmem [shape: bf16[4,8,32], index: 6, kind: input, shape index: {}]   ;;  %s2877_s7 = inlined_call_operand.vmem [shape: bf16[32,128], index: 7, kind: input, shape index: {}]   ;;  %s2878_s8 = inlined_call_operand.vmem [shape: f32[1,128], index: 8, kind: input, shape index: {}]   ;;  %s2879_s9 = inlined_call_operand.vmem [shape: bf16[128,32], index: 9, kind: input, shape index: {}]   ;;  %s2880_s10 = inlined_call_operand.vmem [shape: f32[1,32], index: 10, kind: input, shape index: {}]   ;;  %s2881_s11 = inlined_call_operand.vmem [shape: f32[1,32], index: 11, kind: input, shape index: {}]   ;;  %s2882_s12 = inlined_call_operand.vmem [shape: f32[1,32], index: 12, kind: input, shape index: {}]   ;;  %s2883_s13 = inlined_call_operand.vmem [shape: f32[1,32], index: 13, kind: input, shape index: {}]   ;;  %s2884_s14 = inlined_call_operand.vmem [shape: f32[1,32], index: 14, kind: input, shape index: {}]   ;;  %s2885_s15 = inlined_call_operand.vmem [shape: bf16[32,128], index: 15, kind: input, shape index: {}]   ;;  %s2886_s16 = inlined_call_operand.vmem [shape: f32[1,128], index: 16, kind: input, shape index: {}]   ;;  %s2887_s17 = inlined_call_operand.hbm [shape: f32[2,24,128], index: 17, kind: output, shape index: {}]  }
   0x1   :  { %2897 = sst [smem:[#allocation13_spill]] %s2870_s0 }
   0x2   :  { %2898 = sst [smem:[#allocation14_spill]] %s2871_s1 }
   0x3   :  { %2899 = sst [smem:[#allocation15_spill]] %s2872_s2 }
   0x4   :  { %2900 = sst [smem:[#allocation16_spill]] %s2873_s3 }
   0x5   :  { %2901 = sst [smem:[#allocation17_spill]] %s2887_s17 }
   0x6   :  { %22 = vsyncpa [#allocation4], 0 }
   0x7   :  { %24 = vsyncpa [#allocation4 + $0x1], 0  ;;  %s2396_s24 = smov 0   ;;  %s2398_s25 = smov 0  }
   0x8   :  { %s2400_s26 = smov 0   ;;  %s2402_s27 = smov 0  }
   0x9 LB: > { %2902 = sst [smem:[#allocation6_spill]] %s2278_s24  ;;  %s2417_s28 = sadd.s32 4294967295, %s2290_s27   ;;  %s2290_s27 = sphi %s2402_s27, %s2920_s27   ;;  %s2286_s26 = sphi %s2400_s26, %s2925_s26   ;;  %s2282_s25 = sphi %s2398_s25, %s2924_s25   ;;  %s2278_s24 = sphi %s2396_s24, %s2923_s24  }
   0xa   : > { %2903 = sst [smem:[#allocation7_spill]] %s2286_s26  ;;  %s1871_s29 = sadd.s32 4294967294, %s2290_s27  }
   0xb   : > { %2904 = sst [smem:[#allocation8_spill]] %s2290_s27  ;;  %s2421_s0 = sadd.s32 1, %s2290_s27  }
   0xc   : > { %2905 = sst [smem:[#allocation9_spill]] %s2421_s0  ;;  %s404_s30 = sadd.s32 1, %s2286_s26 }
   0xd   : > { %s401_s18 = ssub.s32 %s2290_s27, %s2421_s0  ;;  %p414_p0 = scmp.ne.s32.totalorder %s2286_s26, %s2282_s25 }
   0xe   : > { %p402_p1 = scmp.eq.s32.totalorder %s401_s18, 0  ;;  %p415_p2 = scmp.eq.s32.totalorder %s2417_s28, 1 }
   0xf   : > { %p420_p3 = scmp.ne.s32.totalorder %s2282_s25, %s2278_s24  ;;  %p421_p4 = scmp.eq.s32.totalorder %s1871_s29, 1 }
  0x10   : > { %s2432_s19 = scalar_select %p402_p1, %s2286_s26, %s404_s30  }
  0x11   : > { %p2434_p5 = por %p415_p2, %p414_p0  ;;  %p2438_p6 = por %p421_p4, %p420_p3 }
  0x12   : > { %2906 = sst [smem:[#allocation10_spill]] %s2432_s19  ;;  %p1874_p7 = scmp.ge.s32.totalorder %s2290_s27, 1 }
  0x13   : > { %s2907_s1 = scalar_select %p2434_p5, 1, 0 }
  0x14   : > { %s2909_s20 = scalar_select %p2438_p6, 1, 0 }
  0x15   : > { %2908 = sst [smem:[#allocation11_spill]] %s2907_s1  ;;  %p499_p8 = scmp.lt.s32.totalorder %s2290_s27, 3 }
  0x16   : > { %2910 = sst [smem:[#allocation12_spill]] %s2909_s20 }
  0x17   : > { %p500_p9 = pnand %p1874_p7, %p499_p8 }
  0x18   : > { %s2911_s3 = sld [smem:[#allocation16_spill]] (!%p500_p9)  ;;  %p555_p10 = scmp.lt.s32.totalorder (!%p500_p9), %s2417_s28, 1 }
  0x19   : > { %503 = sbr.rel (%p500_p9) target bundleno = 2415 (0x96f), region = 88  ;;  %s2912_s27 = sld [smem:[#allocation14_spill]] (!%p500_p9) }
  0x1a   : > { %s2293_s30 = smov (!%p500_p9), 96   ;;  %s2294_s18 = smov (!%p500_p9), 88  }
  0x1b   : > { %s2295_s26 = smov (!%p500_p9), 120   ;;  %s2296_s0 = smov (!%p500_p9), 80  }
  0x1c   : > { %s2298_s24 = smov (!%p500_p9), 72   ;;  %s2914_s2 = sld [smem:[#allocation15_spill]] (!%p500_p9) }
  0x1d   : > { %s2300_s29 = smov (!%p500_p9), 64  }
  0x1e   : > { %v2057_v0 = vld [vmem:[%s2911_s3 + $0x38] sm:$0xff]  ;;  %v2056_v2 = vld [vmem:[%s2911_s3 + $0x30] sm:$0xff]  ;;  %s556_s19 = scalar_select %p555_p10, %s2417_s28, 1  ;;  %v2055_v4 = vld [vmem:[%s2911_s3 + $0x28] sm:$0xff]  ;;  %vm708_vm0 = vcmask 261120   ;;  %vm676_vm1 = vcmask 523264  }
  0x1f   : > { %v2061_v1 = vld [vmem:[%s2911_s3 + $0x58] sm:$0xff]  ;;  %680 = vmatpush.bf16.msra.mxu0 %v2057_v0  ;;  %v2060_v3 = vld [vmem:[%s2911_s3 + $0x50] sm:$0xff]  ;;  %v2059_v6 = vld [vmem:[%s2911_s3 + $0x48] sm:$0xff]  ;;  %v2292_v34 = vmov 32.0   ;;  %vm857_vm12 = vcmask 64512   ;;  %vm896_vm13 = vcmask 195584  }
  0x20   : > { %698 = vmatpush.bf16.msra.mxu1 %v2061_v1  ;;  %s2047_s21 = sshll.u32 %s556_s19, 4  ;;  %s1877_s22 = sshll.u32 %s556_s19, 3  ;;  %v2054_v7 = vld [vmem:[%s2911_s3 + $0x20] sm:$0xff]  ;;  %v2053_v11 = vld [vmem:[%s2911_s3 + $0x18] sm:$0xff]  ;;  %v2052_v13 = vld [vmem:[%s2911_s3 + $0x10] sm:$0xff]  ;;  %2160 = vrcp.f32 %v2292_v34  ;;  %vm1114_vm14 = vcmask 1043456  }
  0x21   : > { %s563_s17 = scalar_lea.vmem %s2912_s27, %s1877_s22  ;;  %s2913_s19 = sld [smem:[#allocation13_spill]]  ;;  %v2058_v8 = vld [vmem:[%s2911_s3 + $0x40] sm:$0xff]  ;;  %v2051_v14 = vld [vmem:[%s2911_s3 + $0x8] sm:$0xff] }
  0x22   : > { %v711_v5 = vld [vmem:[%s563_s17] sm:$0xff]  ;;  %v2063_v56 = vld [vmem:[%s2875_s5 + $0x8] sm:$0xff]  ;;  %s2078_s27 = smul.u32 24, %s2417_s28  ;;  %s2916_s17 = sld [smem:[#allocation17_spill]] }
  0x23   : > { %681 = vmatpush.bf16.msra.mxu0 %v2056_v2  ;;  %712 = vst.msk [vmem:[#allocation2 + $0x10] sm:$0xff] %vm708_vm0, %v711_v5  ;;  %v2050_v15 = vld [vmem:[%s2911_s3] sm:$0xff]  ;;  %833 = vmatpush.bf16.msra.mxu2 %v2063_v56 }
  0x24   : > { %699 = vmatpush.bf16.msra.mxu1 %v2060_v3  ;;  %v2152_v21 = vld [vmem:[%s2874_s4] ss:$0 sm:$0xff] }
  0x25   : > { %v2062_v59 = vld [vmem:[%s2875_s5] sm:$0xff] }
  0x26   : > { %v2161_v35 = vpop.eup %2160 }
  0x27   : > { %s559_s1 = scalar_lea.vmem %s2913_s19, %s2047_s21  ;;  %682 = vmatpush.bf16.msra.mxu0 %v2055_v4  ;;  %v728_v36 = vmul.f32 32.0, %v2161_v35  ;;  %vm732_vm2 = vweird.f32 %v2161_v35  ;;  %834 = vmatpush.bf16.msra.mxu2 %v2062_v59  ;;  %s2297_s19 = smov 112  }
  0x28   : > { %700 = vmatpush.bf16.msra.mxu1 %v2059_v6  ;;  %v2048_v9 = vld [vmem:[%s559_s1 + $0x4] sm:$0xf]  ;;  %v1882_v10 = vld [vmem:[%s559_s1 + $0x8] sm:$0xf0]  ;;  %v1880_v16 = vld [vmem:[%s559_s1] sm:$0xf]  ;;  %s1793_s23 = scalar_lea.hbm %s2916_s17, %s2078_s27 }
  0x29   : > { %v1885_v12 = vor.u32 %v2048_v9, %v1882_v10  ;;  %v2049_v17 = vld [vmem:[%s559_s1 + $0x4] sm:$0xf0]  ;;  %v729_v37 = vsub.f32 1.0, %v728_v36  ;;  %s2299_s1 = smov 104   ;;  %s2248_s20 = scalar_lea.hbm %s2916_s17, 48 }
  0x2a   : > { %v1881_v18 = vor.u32 %v2049_v17, %v1880_v16  ;;  %v2489_v19 = vld [vmem:[#allocation2 + $0x10] sm:$0xff]  ;;  %v2153_v17 = vld [vmem:[%s2881_s11] ss:$0 sm:$0xff] }
  0x2b   : > { %683 = vmatpush.bf16.msra.mxu0 %v2054_v7  ;;  %v724_v20 = vsel %vm708_vm0, %v2489_v19, 0.0  ;;  %v730_v38 = vmul.f32 %v2161_v35, %v729_v37 }
  0x2c   : > { %701 = vmatpush.bf16.msra.mxu1 %v2058_v8  ;;  %725 = vadd.xlane.f32.xlu1 %v724_v20 }
  0x2d   : > { %v731_v39 = vadd.f32 %v2161_v35, %v730_v38 }
  0x2f   : > { %684 = vmatpush.bf16.msra.mxu0 %v2053_v11  ;;  %1934 = vmatmul.msk.bf16.vlgmr.msra.gmra.mxu1 %vm676_vm1, %v1885_v12  ;;  %v2506_v40 = vsel %vm732_vm2, %v2161_v35, %v731_v39 }
  0x33   : > { %685 = vmatpush.bf16.msra.mxu0 %v2052_v13 }
  0x37   : > { %686 = vmatpush.bf16.msra.mxu0 %v2051_v14 }
  0x3b   : > { %687 = vmatpush.bf16.msra.mxu0 %v2050_v15 }
  0x3e   : > { %688 = vmatmul.bf16.vlgmr.msra.gmra.mxu0 %v1881_v18 }
  0x9f   : > { %v726_v45 = vpop.xlane.xlu1 %725 }
  0xa0   : > { %v736_v49 = vmul.f32 %v2506_v40, %v726_v45 }
  0xa2   : > { %v2515_v51 = vsub.f32 %v2489_v19, %v736_v49 }
  0xa4   : > { %v742_v54 = vmul.f32 %v2515_v51, %v2515_v51 }
  0xa6   : > { %v749_v55 = vsel %vm708_vm0, %v742_v54, 0.0 }
  0xac   : > { %v703_v22 = vpop.f32.mrf.mxu1 }
  0xb4   : > { %v705_v28 = vpop.f32.mrf.mxu1 }
  0xbb   : > { %v689_v23 = vpop.f32.mrf.mxu0 }
  0xbc   : > { %v690_v24 = vadd.f32 %v2152_v21, %v689_v23 }
  0xbe   : > { %v704_v25 = vadd.f32 %v703_v22, %v690_v24 }
  0xc0   : > { %709 = vst.msk [vmem:[#allocation2] sm:$0xff] %vm708_vm0, %v704_v25  ;;  %v2154_v25 = vld [vmem:[%s2882_s12] ss:$0 sm:$0xff] }
  0xc3   : > { %v691_v26 = vpop.f32.mrf.mxu0 }
  0xc4   : > { %v692_v27 = vadd.f32 %v2152_v21, %v691_v26 }
  0xc6   : > { %v706_v29 = vadd.f32 %v705_v28, %v692_v27 }
  0xc7   : > { %v2497_v30 = vld [vmem:[#allocation2] sm:$0xff] }
  0xc8   : > { %710 = vst.msk [vmem:[#allocation2 + $0x8] sm:$0xff] %vm708_vm0, %v706_v29  ;;  %v718_v31 = vsel %vm708_vm0, %v2497_v30, 0.0 }
  0xc9   : > { %719 = vadd.xlane.f32.xlu0 %v718_v31 }
  0xcf   : > { %v2502_v32 = vld [vmem:[#allocation2 + $0x8] sm:$0xff] }
  0xd0   : > { %v721_v33 = vsel %vm708_vm0, %v2502_v32, 0.0 }
  0xd1   : > { %722 = vadd.xlane.f32.xlu0 %v721_v33 }
 0x13c   : > { %v720_v41 = vpop.xlane.xlu0 %719 }
 0x13d   : > { %v734_v42 = vmul.f32 %v2506_v40, %v720_v41 }
 0x13f   : > { %v737_v43 = vsub.f32 %v2497_v30, %v734_v42 }
 0x141   : > { %v740_v44 = vmul.f32 %v737_v43, %v737_v43 }
 0x143   : > { %v743_v46 = vsel %vm708_vm0, %v740_v44, 0.0 }
 0x144   : > { %744 = vadd.xlane.f32.xlu1 %v743_v46  ;;  %v723_v47 = vpop.xlane.xlu0 %722 }
 0x145   : > { %v735_v48 = vmul.f32 %v2506_v40, %v723_v47 }
 0x147   : > { %v738_v50 = vsub.f32 %v2502_v32, %v735_v48 }
 0x149   : > { %v741_v52 = vmul.f32 %v738_v50, %v738_v50 }
 0x14b   : > { %v746_v53 = vsel %vm708_vm0, %v741_v52, 0.0 }
 0x14c   : > { %747 = vadd.xlane.f32.xlu2 %v746_v53 }
 0x154   : > { %750 = vadd.xlane.f32.xlu2 %v749_v55 }
 0x1b7   : > { %v745_v57 = vpop.xlane.xlu1 %744 }
 0x1b8   : > { %v752_v58 = vmul.f32 %v745_v57, %v2506_v40 }
 0x1ba   : > { %v755_v60 = vadd.f32 1e-05, %v752_v58 }
 0x1bc   : > { %2162 = vrsqrt.f32 %v755_v60  ;;  %vm764_vm4 = vweird.f32 %v755_v60 }
 0x1bf   : > { %v748_v61 = vpop.xlane.xlu2 %747 }
 0x1c0   : > { %v753_v62 = vmul.f32 %v748_v61, %v2506_v40 }
 0x1c2   : > { %v2163_v63 = vpop.eup %2162  ;;  %v756_v0 = vadd.f32 1e-05, %v753_v62 }
 0x1c3   : > { %v759_v1 = vmul.f32 %v2163_v63, %v755_v60  ;;  %vm765_vm3 = vweird.f32 %v2163_v63 }
 0x1c4   : > { %2164 = vrsqrt.f32 %v756_v0  ;;  %vm766_vm5 = vmor %vm764_vm4, %vm765_vm3  ;;  %vm774_vm7 = vweird.f32 %v756_v0 }
 0x1c5   : > { %v760_v2 = vmul.f32 %v2163_v63, %v759_v1  ;;  %v2596_v1 = vld [vmem:[%s2914_s2] sm:$0xff] }
 0x1c7   : > { %v761_v3 = vmul.f32 0.5, %v760_v2  ;;  %v751_v4 = vpop.xlane.xlu2 %750 }
 0x1c8   : > { %v754_v5 = vmul.f32 %v751_v4, %v2506_v40 }
 0x1c9   : > { %v762_v6 = vsub.f32 1.5, %v761_v3 }
 0x1ca   : > { %v2165_v7 = vpop.eup %2164  ;;  %v757_v8 = vadd.f32 1e-05, %v754_v5  ;;  %v2603_v5 = vld [vmem:[%s2914_s2 + $0x8] sm:$0xff] }
 0x1cb   : > { %v763_v9 = vmul.f32 %v2163_v63, %v762_v6  ;;  %v769_v10 = vmul.f32 %v2165_v7, %v756_v0  ;;  %vm775_vm6 = vweird.f32 %v2165_v7 }
 0x1cc   : > { %2166 = vrsqrt.f32 %v757_v8  ;;  %vm776_vm8 = vmor %vm774_vm7, %vm775_vm6  ;;  %vm784_vm9 = vweird.f32 %v757_v8 }
 0x1cd   : > { %v770_v11 = vmul.f32 %v2165_v7, %v769_v10  ;;  %v767_v12 = vsel %vm766_vm5, %v2163_v63, %v763_v9  ;;  %v2610_v9 = vld [vmem:[%s2914_s2 + $0x10] sm:$0xff] }
 0x1ce   : > { %v788_v16 = vmul.f32 %v767_v12, %v737_v43 }
 0x1cf   : > { %v771_v13 = vmul.f32 0.5, %v770_v11 }
 0x1d0   : > { %v794_v24 = vmul.f32 %v2153_v17, %v788_v16 }
 0x1d1   : > { %v772_v14 = vsub.f32 1.5, %v771_v13 }
 0x1d2   : > { %v2167_v15 = vpop.eup %2166  ;;  %v800_v29 = vadd.f32 %v2154_v25, %v794_v24 }
 0x1d3   : > { %v773_v18 = vmul.f32 %v2165_v7, %v772_v14  ;;  %v779_v20 = vmul.f32 %v2167_v15, %v757_v8  ;;  %vm785_vm10 = vweird.f32 %v2167_v15 }
 0x1d4   : > { %vm786_vm11 = vmor %vm784_vm9, %vm785_vm10 }
 0x1d5   : > { %v777_v21 = vsel %vm776_vm8, %v2165_v7, %v773_v18  ;;  %v780_v22 = vmul.f32 %v2167_v15, %v779_v20 }
 0x1d6   : > { %v789_v23 = vmul.f32 %v777_v21, %v738_v50 }
 0x1d7   : > { %v781_v26 = vmul.f32 0.5, %v780_v22 }
 0x1d8   : > { %v795_v27 = vmul.f32 %v2153_v17, %v789_v23 }
 0x1d9   : > { %v782_v28 = vsub.f32 1.5, %v781_v26 }
 0x1da   : > { %v801_v31 = vadd.f32 %v2154_v25, %v795_v27 }
 0x1db   : > { %v783_v33 = vmul.f32 %v2167_v15, %v782_v28 }
 0x1dc   : > { %v803_v34 = vpack.c.bf16 %v801_v31, %v800_v29 }
 0x1dd   : > { %v787_v35 = vsel %vm786_vm11, %v2167_v15, %v783_v33 }
 0x1de   : > { %1943 = vmatmul.msk.bf16.vlgmr.msra.gmra.mxu2 %vm708_vm0, %v803_v34  ;;  %v790_v36 = vmul.f32 %v787_v35, %v2515_v51 }
 0x1e0   : > { %v796_v37 = vmul.f32 %v2153_v17, %v790_v36 }
 0x1e2   : > { %v802_v38 = vadd.f32 %v2154_v25, %v796_v37 }
 0x1e4   : > { %v804_v39 = vpack.c.bf16 %v802_v38, %v802_v38 }
 0x1ee   : > { %1944 = vmatmul.msk.bf16.gmra.mxu2 %vm708_vm0, %v804_v39 }
 0x261   : > { %v2539_v41 = vpop.f32.mrf.mxu2 }
 0x262   : > { %851 = vrot.lane.b32.xlu2 %v2539_v41, %s2293_s30 }
 0x269   : > { %v2542_v42 = vpop.f32.mrf.mxu2 }
 0x26a   : > { %985 = vrot.lane.b32.xlu2 %v2542_v42, %s2294_s18  ;;  %853 = vrot.lane.b32.xlu1 %v2542_v42, %s2293_s30 }
 0x271   : > { %v2546_v43 = vpop.f32.mrf.mxu2 }
 0x272   : > { %979 = vrot.lane.b32.xlu2 %v2542_v42, %s2295_s26  ;;  %983 = vrot.lane.b32.xlu1 %v2539_v41, %s2294_s18  ;;  %v2618_v16 = vpack.i.bf16 %v2542_v42, %v2546_v43 }
 0x273   : > { %855 = vrot.lane.b32.xlu0 %v2546_v43, %s2293_s30  ;;  %s2301_s30 = smov 56  }
 0x279   : > { %v843_v44 = vpop.f32.mrf.mxu2 }
 0x27a   : > { %1171 = vrot.lane.b32.xlu2 %v2542_v42, %s2296_s0  ;;  %981 = vrot.lane.b32.xlu1 %v2546_v43, %s2295_s26 }
 0x27b   : > { %987 = vrot.lane.b32.xlu0 %v2546_v43, %s2294_s18  ;;  %s2302_s18 = smov 40  }
 0x282   : > { %1165 = vrot.lane.b32.xlu2 %v2542_v42, %s2297_s19  ;;  %1169 = vrot.lane.b32.xlu1 %v2539_v41, %s2296_s0 }
 0x283   : > { %977 = vrot.lane.b32.xlu0 %v2539_v41, %s2295_s26 }
 0x28a   : > { %1332 = vrot.lane.b32.xlu2 %v2542_v42, %s2298_s24  ;;  %1330 = vrot.lane.b32.xlu1 %v2539_v41, %s2298_s24 }
 0x28b   : > { %1163 = vrot.lane.b32.xlu0 %v2539_v41, %s2297_s19 }
 0x292   : > { %1334 = vrot.lane.b32.xlu1 %v2546_v43, %s2298_s24 }
 0x293   : > { %1324 = vrot.lane.b32.xlu0 %v2539_v41, %s2299_s1 }
 0x29b   : > { %1173 = vrot.lane.b32.xlu0 %v2546_v43, %s2296_s0 }
 0x2a3   : > { %1326 = vrot.lane.b32.xlu0 %v2542_v42, %s2299_s1 }
 0x2ab   : > { %1167 = vrot.lane.b32.xlu0 %v2546_v43, %s2297_s19  ;;  %s2303_s19 = smov 48  }
 0x2bc   : > { %v852_v47 = vpop.permute.xlu2 %851 }
 0x2c4   : > { %v986_v50 = vpop.permute.xlu2 %985 }
 0x2cc   : > { %v980_v53 = vpop.permute.xlu2 %979 }
 0x2d4   : > { %v1172_v57 = vpop.permute.xlu2 %1171 }
 0x2dc   : > { %v854_v45 = vpop.permute.xlu1 %853  ;;  %v1166_v60 = vpop.permute.xlu2 %1165 }
 0x2e4   : > { %v984_v49 = vpop.permute.xlu1 %983  ;;  %v1333_v62 = vpop.permute.xlu2 %1332 }
 0x2e5   : > { %v856_v46 = vpop.permute.xlu0 %855 }
 0x2e6   : > { %1945 = vmatpush.xpose.msk.msra.mxu3 %vm857_vm12, %v856_v46 }
 0x2ea   : > { %1946 = vmatpush.xpose.msk.msra.mxu3 %vm857_vm12, %v854_v45 }
 0x2ec   : > { %v982_v52 = vpop.permute.xlu1 %981 }
 0x2ed   : > { %v988_v48 = vpop.permute.xlu0 %987 }
 0x2ee   : > { %1947 = vmatpush.xpose.msk.msra.mxu3 %vm857_vm12, %v852_v47 }
 0x2f1   : > { %1948 = vmatmul.msk.f32.vlgmr.msra.gmra.mxu3 %vm857_vm12, %v2539_v41 }
 0x2f2   : > { %1954 = vmatpush.xpose.msk.msrb.mxu3 %vm857_vm12, %v988_v48 }
 0x2f4   : > { %v1170_v55 = vpop.permute.xlu1 %1169 }
 0x2f5   : > { %v978_v51 = vpop.permute.xlu0 %977 }
 0x2f6   : > { %1955 = vmatpush.xpose.msk.msrb.mxu3 %vm857_vm12, %v986_v50 }
 0x2f9   : > { %1949 = vmatmul.msk.f32.gmra.mxu3 %vm857_vm12, %v2542_v42 }
 0x2fa   : > { %1956 = vmatpush.xpose.msk.msrb.mxu3 %vm857_vm12, %v984_v49 }
 0x2fc   : > { %v1331_v58 = vpop.permute.xlu1 %1330 }
 0x2fd   : > { %v1164_v54 = vpop.permute.xlu0 %1163 }
 0x301   : > { %1950 = vmatmul.msk.f32.gmra.mxu3 %vm857_vm12, %v2546_v43 }
 0x304   : > { %v1335_v61 = vpop.permute.xlu1 %1334 }
 0x305   : > { %v1325_v56 = vpop.permute.xlu0 %1324 }
 0x309   : > { %1957 = vmatmul.msk.f32.vlgmr.msrb.gmra.mxu3 %vm857_vm12, %v978_v51 }
 0x30d   : > { %v1174_v59 = vpop.permute.xlu0 %1173 }
 0x30e   : > { %1968 = vmatpush.xpose.msk.msra.mxu3 %vm857_vm12, %v1174_v59 }
 0x311   : > { %1958 = vmatmul.msk.f32.gmra.mxu3 %vm857_vm12, %v980_v53 }
 0x312   : > { %1969 = vmatpush.xpose.msk.msra.mxu3 %vm857_vm12, %v1172_v57 }
 0x315   : > { %v1327_v63 = vpop.permute.xlu0 %1326 }
 0x316   : > { %1970 = vmatpush.xpose.msk.msra.mxu3 %vm857_vm12, %v1170_v55 }
 0x319   : > { %1959 = vmatmul.msk.f32.gmra.mxu3 %vm857_vm12, %v982_v52 }
 0x31a   : > { %1980 = vmatpush.xpose.msk.msrb.mxu3 %vm857_vm12, %v1335_v61 }
 0x31d   : > { %v1168_v0 = vpop.permute.xlu0 %1167 }
 0x31e   : > { %1981 = vmatpush.xpose.msk.msrb.mxu3 %vm857_vm12, %v1333_v62 }
 0x321   : > { %1971 = vmatmul.msk.f32.vlgmr.msra.gmra.mxu3 %vm857_vm12, %v1164_v54 }
 0x322   : > { %1982 = vmatpush.xpose.msk.msrb.mxu3 %vm857_vm12, %v1331_v58 }
 0x329   : > { %1972 = vmatmul.msk.f32.gmra.mxu3 %vm857_vm12, %v1166_v60 }
 0x331   : > { %1973 = vmatmul.msk.f32.gmra.mxu3 %vm857_vm12, %v1168_v0 }
 0x339   : > { %1983 = vmatmul.msk.f32.vlgmr.msrb.gmra.mxu3 %vm857_vm12, %v1325_v56 }
 0x341   : > { %1984 = vmatmul.msk.f32.gmra.mxu3 %vm857_vm12, %v1327_v63 }
 0x374   : > { %v887_v2 = vpop.f32.mrf.mxu3 }
 0x375   : > { %v888_v3 = vadd.f32 %v887_v2, %v2596_v1 }
 0x377   : > { %v897_v4 = vsel %vm896_vm13, %v888_v3, -inf }
 0x378   : > { %898 = vmax.xlane.f32.xlu2 %v897_v4 }
 0x37c   : > { %v890_v6 = vpop.f32.mrf.mxu3 }
 0x37d   : > { %v891_v7 = vadd.f32 %v890_v6, %v2603_v5 }
 0x37f   : > { %v900_v8 = vsel %vm896_vm13, %v891_v7, -inf }
 0x380   : > { %901 = vmax.xlane.f32.xlu0 %v900_v8 }
 0x384   : > { %v893_v10 = vpop.f32.mrf.mxu3 }
 0x385   : > { %v894_v11 = vadd.f32 %v893_v10, %v2610_v9 }
 0x387   : > { %v903_v12 = vsel %vm896_vm13, %v894_v11, -inf }
 0x388   : > { %904 = vmax.xlane.f32.xlu2 %v903_v12 }
 0x38c   : > { %v1018_v13 = vpop.f32.mrf.mxu3 }
 0x38d   : > { %v1019_v14 = vadd.f32 %v1018_v13, %v2596_v1 }
 0x38f   : > { %v1027_v15 = vsel %vm896_vm13, %v1019_v14, -inf }
 0x390   : > { %1028 = vmax.xlane.f32.xlu1 %v1027_v15 }
 0x394   : > { %2133 = vrot.lane.b32.xlu0 %v2618_v16, %s2300_s29  ;;  %v1021_v17 = vpop.f32.mrf.mxu3 }
 0x395   : > { %v1022_v18 = vadd.f32 %v1021_v17, %v2603_v5 }
 0x397   : > { %v1030_v20 = vsel %vm896_vm13, %v1022_v18, -inf }
 0x398   : > { %1031 = vmax.xlane.f32.xlu2 %v1030_v20 }
 0x39c   : > { %v1024_v21 = vpop.f32.mrf.mxu3 }
 0x39d   : > { %v2625_v22 = vadd.f32 %v1024_v21, %v2610_v9 }
 0x39f   : > { %v1033_v23 = vsel %vm896_vm13, %v2625_v22, -inf }
 0x3a0   : > { %1034 = vmax.xlane.f32.xlu1 %v1033_v23 }
 0x3a4   : > { %v1204_v24 = vpop.f32.mrf.mxu3 }
 0x3a5   : > { %v1205_v6 = vadd.f32 %v1204_v24, %v2596_v1 }
 0x3ac   : > { %v1207_v28 = vpop.f32.mrf.mxu3 }
 0x3ad   : > { %v1208_v8 = vadd.f32 %v1207_v28, %v2603_v5 }
 0x3b0   : > { %2138 = vrot.lane.b32.xlu2 %v2618_v16, %s2301_s30 }
 0x3b4   : > { %v1210_v37 = vpop.f32.mrf.mxu3 }
 0x3b5   : > { %v2667_v12 = vadd.f32 %v1210_v37, %v2610_v9 }
 0x3b9   : > { %1328 = vrot.lane.b32.xlu1 %v2546_v43, %s2299_s1 }
 0x3bc   : > { %v1365_v47 = vpop.f32.mrf.mxu3 }
 0x3bd   : > { %v2646_v53 = vadd.f32 %v1365_v47, %v2596_v1  ;;  %v1219_v1 = vsel %vm896_vm13, %v2667_v12, -inf }
 0x3bf   : > { %v1374_v59 = vsel %vm896_vm13, %v2646_v53, -inf }
 0x3c4   : > { %v1368_v60 = vpop.f32.mrf.mxu3 }
 0x3c5   : > { %v2652_v61 = vadd.f32 %v1368_v60, %v2603_v5 }
 0x3c7   : > { %v1377_v2 = vsel %vm896_vm13, %v2652_v61, -inf }
 0x3eb   : > { %v899_v25 = vpop.xlane.xlu2 %898 }
 0x3ec   : > { %v906_v26 = vsub.f32 %v888_v3, %v899_v25 }
 0x3ee   : > { %v909_v27 = vmul.f32 1.442695, %v906_v26 }
 0x3f0   : > { %2168 = vpow2.f32 %v909_v27 }
 0x3f3   : > { %v902_v29 = vpop.xlane.xlu0 %901 }
 0x3f4   : > { %v907_v31 = vsub.f32 %v891_v7, %v902_v29  ;;  %v1213_v7 = vsel %vm896_vm13, %v1205_v6, -inf }
 0x3f6   : > { %v2633_v33 = vpop.eup %2168  ;;  %v911_v34 = vmul.f32 1.442695, %v907_v31 }
 0x3f7   : > { %v915_v35 = vsel %vm896_vm13, %v2633_v33, 0.0 }
 0x3f8   : > { %2170 = vpow2.f32 %v911_v34  ;;  %916 = vadd.xlane.f32.xlu0 %v915_v35 }
 0x3fb   : > { %v905_v36 = vpop.xlane.xlu2 %904 }
 0x3fc   : > { %v908_v38 = vsub.f32 %v894_v11, %v905_v36  ;;  %v1216_v11 = vsel %vm896_vm13, %v1208_v8, -inf }
 0x3fe   : > { %v2637_v39 = vpop.eup %2170  ;;  %v913_v42 = vmul.f32 1.442695, %v908_v38 }
 0x3ff   : > { %v918_v43 = vsel %vm896_vm13, %v2637_v39, 0.0 }
 0x400   : > { %2172 = vpow2.f32 %v913_v42  ;;  %919 = vadd.xlane.f32.xlu1 %v918_v43 }
 0x403   : > { %v1029_v44 = vpop.xlane.xlu1 %1028 }
 0x404   : > { %v1036_v45 = vsub.f32 %v1019_v14, %v1029_v44 }
 0x406   : > { %v2641_v46 = vpop.eup %2172  ;;  %v1039_v48 = vmul.f32 1.442695, %v1036_v45  ;;  %v2134_v49 = vpop.permute.xlu0 %2133 }
 0x407   : > { %v921_v50 = vsel %vm896_vm13, %v2641_v46, 0.0  ;;  %v2135_v51 = vunpack.i.l.bf16 %v2134_v49  ;;  %v2136_v52 = vunpack.i.h.bf16 %v2134_v49 }
 0x408   : > { %2174 = vpow2.f32 %v1039_v48  ;;  %922 = vadd.xlane.f32.xlu1 %v921_v50 }
 0x409   : > { %961 = vmatpush.msrb.mxu1 %v2135_v51 }
 0x40b   : > { %962 = vmatpush.msrb.mxu1 %v2136_v52  ;;  %v1032_v54 = vpop.xlane.xlu2 %1031 }
 0x40c   : > { %v1037_v55 = vsub.f32 %v1022_v18, %v1032_v54 }
 0x40e   : > { %v2175_v56 = vpop.eup %2174  ;;  %v1041_v57 = vmul.f32 1.442695, %v1037_v55 }
 0x40f   : > { %v1045_v58 = vsel %vm896_vm13, %v2175_v56, 0.0 }
 0x410   : > { %2176 = vpow2.f32 %v1041_v57  ;;  %1046 = vadd.xlane.f32.xlu2 %v1045_v58  ;;  %1375 = vmax.xlane.f32.xlu1 %v1374_v59  ;;  %v976_v58 = vld [vmem:[%s2876_s6] sm:$0xf] }
 0x411   : > { %v1143_v59 = vsel %vm1114_vm14, %v976_v58, 0 }
 0x413   : > { %v2139_v62 = vpop.permute.xlu2 %2138  ;;  %v1035_v10 = vpop.xlane.xlu1 %1034 }
 0x414   : > { %v2140_v63 = vunpack.i.l.bf16 %v2139_v62  ;;  %v2141_v4 = vunpack.i.h.bf16 %v2139_v62  ;;  %v1038_v5 = vsub.f32 %v2625_v22, %v1035_v10 }
 0x416   : > { %v2654_v0 = vpop.eup %2176  ;;  %1091 = vmatpush.msrb.mxu2 %v2140_v63  ;;  %v1043_v14 = vmul.f32 1.442695, %v1038_v5 }
 0x417   : > { %v1048_v3 = vsel %vm896_vm13, %v2654_v0, 0.0 }
 0x418   : > { %1378 = vmax.xlane.f32.xlu1 %v1377_v2  ;;  %1049 = vadd.xlane.f32.xlu0 %v1048_v3  ;;  %2178 = vpow2.f32 %v1043_v14 }
 0x419   : > { %1092 = vmatpush.msrb.mxu2 %v2141_v4 }
 0x41e   : > { %v2675_v15 = vpop.eup %2178 }
 0x41f   : > { %v1051_v17 = vsel %vm896_vm13, %v2675_v15, 0.0 }
 0x420   : > { %1214 = vmax.xlane.f32.xlu0 %v1213_v7 }
 0x428   : > { %930 = vrot.lane.b32.xlu2 %v2539_v41, %s2300_s29  ;;  %1217 = vmax.xlane.f32.xlu0 %v1216_v11  ;;  %s1796_s29 = sshll.u32 %s1793_s23, 4  ;;  %s1797_s29 = int_to_ptr.hbm [resolvable:$true] %s1796_s29 }
 0x429   : > { %s2242_s0 = sshra.s32 %s1797_s29, 4  ;;  %s2243_s0 = int_to_ptr.hbm [resolvable:$true] %s2242_s0 }
 0x42a   : > { %p2249_p0 = scmp.lt.s32.totalorder %s2243_s0, %s2916_s17 }
 0x42b   : > { %v1329_v13 = vpop.permute.xlu1 %1328 }
 0x42c   : > { %1985 = vmatmul.msk.f32.gmra.mxu3 %vm857_vm12, %v1329_v13 }
 0x430   : > { %1060 = vrot.lane.b32.xlu2 %v2539_v41, %s2301_s30  ;;  %1220 = vmax.xlane.f32.xlu0 %v1219_v1 }
 0x459   : > { %1052 = vadd.xlane.f32.xlu2 %v1051_v17 }
 0x46b   : > { %v917_v18 = vpop.xlane.xlu0 %916 }
 0x46c   : > { %2180 = vrcp.f32 %v917_v18 }
 0x471   : > { %2148 = vrot.lane.b32.xlu2 %v2618_v16, %s2302_s18 }
 0x472   : > { %v2181_v23 = vpop.eup %2180 }
 0x473   : > { %v920_v21 = vpop.xlane.xlu1 %919  ;;  %v927_v25 = vmul.f32 %v2181_v23, %v2633_v33 }
 0x474   : > { %2182 = vrcp.f32 %v920_v21 }
 0x47a   : > { %v2183_v27 = vpop.eup %2182 }
 0x47b   : > { %v923_v26 = vpop.xlane.xlu1 %922  ;;  %v928_v35 = vmul.f32 %v2183_v27, %v2637_v39 }
 0x483   : > { %v1047_v20 = vpop.xlane.xlu2 %1046  ;;  %v1376_v42 = vpop.xlane.xlu1 %1375 }
 0x484   : > { %2184 = vrcp.f32 %v1047_v20  ;;  %v1383_v39 = vsub.f32 %v2646_v53, %v1376_v42 }
 0x485   : > { %2186 = vrcp.f32 %v923_v26 }
 0x486   : > { %v1386_v51 = vmul.f32 1.442695, %v1383_v39 }
 0x48a   : > { %v2185_v28 = vpop.eup %2184 }
 0x48b   : > { %v1050_v22 = vpop.xlane.xlu0 %1049  ;;  %v931_v24 = vpop.permute.xlu2 %930  ;;  %v1057_v36 = vmul.f32 %v2185_v28, %v2175_v56 }
 0x48c   : > { %963 = vmatpush.msrb.mxu1 %v931_v24  ;;  %2188 = vrcp.f32 %v1050_v22  ;;  %v2187_v33 = vpop.eup %2186  ;;  %v1379_v7 = vpop.xlane.xlu1 %1378 }
 0x48d   : > { %1951 = vmatmul.msk.f32.vlgmr.msrb.gmra.mxu1 %vm896_vm13, %v927_v25  ;;  %v929_v45 = vmul.f32 %v2187_v33, %v2641_v46 }
 0x48e   : > { %1152 = vmatpush.bf16.msra.mxu1 %v1143_v59 }
 0x492   : > { %v2189_v38 = vpop.eup %2188 }
 0x493   : > { %v1215_v29 = vpop.xlane.xlu0 %1214  ;;  %v1061_v34 = vpop.permute.xlu2 %1060  ;;  %v1058_v47 = vmul.f32 %v2189_v38, %v2654_v0 }
 0x494   : > { %v1222_v31 = vsub.f32 %v1205_v6, %v1215_v29  ;;  %1093 = vmatpush.msrb.mxu2 %v1061_v34 }
 0x495   : > { %1952 = vmatmul.msk.f32.gmra.mxu1 %vm896_vm13, %v928_v35  ;;  %1960 = vmatmul.msk.f32.vlgmr.msrb.gmra.mxu2 %vm896_vm13, %v1057_v36 }
 0x496   : > { %v1225_v37 = vmul.f32 1.442695, %v1222_v31 }
 0x498   : > { %2190 = vpow2.f32 %v1225_v37 }
 0x49b   : > { %v1218_v43 = vpop.xlane.xlu0 %1217 }
 0x49c   : > { %v1223_v44 = vsub.f32 %v1208_v8, %v1218_v43 }
 0x49d   : > { %1953 = vmatmul.msk.f32.gmra.mxu1 %vm896_vm13, %v929_v45  ;;  %1961 = vmatmul.msk.f32.gmra.mxu2 %vm896_vm13, %v1058_v47 }
 0x49e   : > { %v2688_v48 = vpop.eup %2190  ;;  %v1227_v49 = vmul.f32 1.442695, %v1223_v44 }
 0x49f   : > { %v1231_v50 = vsel %vm896_vm13, %v2688_v48, 0.0 }
 0x4a0   : > { %2192 = vpow2.f32 %v1227_v49  ;;  %1232 = vadd.xlane.f32.xlu2 %v1231_v50 }
 0x4a1   : > { %2194 = vpow2.f32 %v1386_v51 }
 0x4a3   : > { %v1221_v3 = vpop.xlane.xlu0 %1220 }
 0x4a4   : > { %v1224_v4 = vsub.f32 %v2667_v12, %v1221_v3  ;;  %v1963_v12 = vld [vmem:[%s2876_s6 + $0x4] sm:$0xf] }
 0x4a5   : > { %v1116_v1 = vsel %vm1114_vm14, %v1963_v12, 0 }
 0x4a6   : > { %v2695_v52 = vpop.eup %2192  ;;  %v1229_v6 = vmul.f32 1.442695, %v1224_v4  ;;  %1125 = vmatpush.bf16.msrb.mxu0 %v1116_v1  ;;  %2076 = vmatpush.bf16.msra.mxu2 %v1116_v1 }
 0x4a7   : > { %v1234_v46 = vsel %vm896_vm13, %v2695_v52, 0.0  ;;  %v2699_v54 = vpop.eup %2194 }
 0x4a8   : > { %1235 = vadd.xlane.f32.xlu0 %v1234_v46  ;;  %v1392_v55 = vsel %vm896_vm13, %v2699_v54, 0.0 }
 0x4af   : > { %v1371_v53 = vpop.f32.mrf.mxu3 }
 0x4b0   : > { %v1372_v56 = vadd.f32 %v1371_v53, %v2610_v9  ;;  %1393 = vadd.xlane.f32.xlu0 %v1392_v55 }
 0x4b2   : > { %v1380_v57 = vsel %vm896_vm13, %v1372_v56, -inf }
 0x4b3   : > { %1381 = vmax.xlane.f32.xlu1 %v1380_v57 }
 0x4b8   : > { %1407 = vrot.lane.b32.xlu2 %v2539_v41, %s2302_s18  ;;  %s552_s18 = sand.u32 1, %s2282_s25  }
 0x4b9   : > { %s2077_s26 = smul.u32 24, %s552_s18  ;;  %s1782_s30 = scalar_lea.sflag [#allocation4], %s552_s18 }
 0x4bb   : > { %s554_s24 = scalar_lea.vmem [#allocation3], %s2077_s26  ;;  %s2244_s26 = scalar_lea.hbm %s2243_s0, 24 }
 0x4bc   : > { %s1794_s21 = sshll.u32 %s554_s24, 4  ;;  %p2245_p11 = scmp.ne.s32.totalorder %s2243_s0, %s2244_s26  ;;  %s1795_s21 = int_to_ptr.vmem [resolvable:$true] %s1794_s21 }
 0x4bd   : > { %p2250_p1 = scmp.lt.s32.totalorder %s2248_s20, %s2244_s26 }
 0x4be   : > { %p2246_p12 = pnand %p2245_p11, %p2434_p5 }
 0x4bf   : > { %p2251_p2 = por %p2250_p1, %p2249_p0 }
 0x4c0   : > { %p2247_p13 = pneg %p2246_p12 }
 0x4c2   : > { %p2252_p3 = pnand %p2251_p2, %p2247_p13 }
 0x4c4   : > { %1246 = vrot.lane.b32.xlu0 %v2539_v41, %s2303_s19  ;;  %v1384_v41 = vsub.f32 %v2652_v61, %v1379_v7 }
 0x4cc   : > { %2143 = vrot.lane.b32.xlu1 %v2618_v16, %s2303_s19  ;;  %v1053_v9 = vpop.xlane.xlu2 %1052  ;;  %v1388_v16 = vmul.f32 1.442695, %v1384_v41 }
 0x4cd   : > { %2196 = vrcp.f32 %v1053_v9 }
 0x4ce   : > { %2198 = vpow2.f32 %v1229_v6 }
 0x4cf   : > { %2200 = vpow2.f32 %v1388_v16 }
 0x4d3   : > { %v2197_v60 = vpop.eup %2196 }
 0x4d4   : > { %v2149_v62 = vpop.permute.xlu2 %2148  ;;  %v1059_v63 = vmul.f32 %v2197_v60, %v2675_v15  ;;  %v2717_v8 = vpop.eup %2198 }
 0x4d5   : > { %v2150_v0 = vunpack.i.l.bf16 %v2149_v62  ;;  %v2151_v2 = vunpack.i.h.bf16 %v2149_v62  ;;  %v1237_v10 = vsel %vm896_vm13, %v2717_v8, 0.0  ;;  %v2201_v11 = vpop.eup %2200  ;;  %v1977_v62 = vld [vmem:[%s2876_s6 + $0x8] sm:$0xf] }
 0x4d6   : > { %1962 = vmatmul.msk.f32.gmra.mxu2 %vm896_vm13, %v1059_v63  ;;  %v1395_v13 = vsel %vm896_vm13, %v2201_v11, 0.0  ;;  %v1301_v63 = vsel %vm1114_vm14, %v1977_v62, 0 }
 0x4d7   : > { %1438 = vmatpush.msrb.mxu1 %v2150_v0  ;;  %1310 = vmatpush.bf16.msra.mxu0 %v1301_v63 }
 0x4d9   : > { %1439 = vmatpush.msrb.mxu1 %v2151_v2 }
 0x4ee   : > { %1238 = vadd.xlane.f32.xlu0 %v1237_v10 }
 0x4f6   : > { %1396 = vadd.xlane.f32.xlu1 %v1395_v13 }
 0x50a   : > { %v965_v61 = vpop.f32.mrf.mxu1 }
 0x512   : > { %v968_v5 = vpop.f32.mrf.mxu1 }
 0x513   : > { %v1233_v14 = vpop.xlane.xlu2 %1232  ;;  %v974_v15 = vpack.c.bf16 %v968_v5, %v965_v61 }
 0x515   : > { %1966 = vmatmul.msk.bf16.vlgmr.msra.gmra.mxu1 %vm857_vm12, %v974_v15 }
 0x518   : > { %v1095_v17 = vpop.f32.mrf.mxu2 }
 0x51a   : > { %v971_v21 = vpop.f32.mrf.mxu1 }
 0x51b   : > { %v1408_v18 = vpop.permute.xlu2 %1407  ;;  %v1236_v20 = vpop.xlane.xlu0 %1235  ;;  %v975_v24 = vpack.c.bf16 %v971_v21, %v971_v21 }
 0x51c   : > { %1440 = vmatpush.msrb.mxu1 %v1408_v18 }
 0x520   : > { %v1098_v23 = vpop.f32.mrf.mxu2 }
 0x521   : > { %v1104_v22 = vpack.c.bf16 %v1098_v23, %v1095_v17 }
 0x523   : > { %1964 = vmatmul.msk.bf16.vlgmr.msrb.gmra.mxu0 %vm857_vm12, %v1104_v22  ;;  %v1394_v26 = vpop.xlane.xlu0 %1393 }
 0x524   : > { %2202 = vrcp.f32 %v1394_v26 }
 0x525   : > { %1967 = vmatmul.msk.bf16.gmra.mxu1 %vm857_vm12, %v975_v24 }
 0x526   : > { %v1382_v25 = vpop.xlane.xlu1 %1381 }
 0x527   : > { %v1385_v27 = vsub.f32 %v1372_v56, %v1382_v25 }
 0x529   : > { %v1390_v28 = vmul.f32 1.442695, %v1385_v27 }
 0x52a   : > { %v2203_v29 = vpop.eup %2202 }
 0x52b   : > { %2204 = vpow2.f32 %v1390_v28  ;;  %v1404_v35 = vmul.f32 %v2203_v29, %v2699_v54 }
 0x52c   : > { %2206 = vrcp.f32 %v1233_v14 }
 0x52d   : > { %2208 = vrcp.f32 %v1236_v20 }
 0x531   : > { %v2205_v31 = vpop.eup %2204 }
 0x532   : > { %v1398_v34 = vsel %vm896_vm13, %v2205_v31, 0.0  ;;  %v2207_v44 = vpop.eup %2206 }
 0x533   : > { %1399 = vadd.xlane.f32.xlu2 %v1398_v34  ;;  %v1243_v47 = vmul.f32 %v2207_v44, %v2688_v48  ;;  %v2209_v49 = vpop.eup %2208 }
 0x534   : > { %v1244_v46 = vmul.f32 %v2209_v49, %v2695_v52  ;;  %v1989_v52 = vld [vmem:[%s2876_s6 + $0xc] sm:$0xf] }
 0x535   : > { %1986 = vmatmul.msk.f32.vlgmr.msrb.gmra.mxu1 %vm896_vm13, %v1404_v35  ;;  %v1462_v60 = vsel %vm1114_vm14, %v1989_v52, 0 }
 0x536   : > { %v1247_v38 = vpop.permute.xlu0 %1246 }
 0x53e   : > { %v2144_v36 = vpop.permute.xlu1 %2143 }
 0x53f   : > { %v2145_v37 = vunpack.i.l.bf16 %v2144_v36  ;;  %v2146_v33 = vunpack.i.h.bf16 %v2144_v36 }
 0x541   : > { %1277 = vmatpush.msrb.mxu2 %v2145_v37 }
 0x543   : > { %1278 = vmatpush.msrb.mxu2 %v2146_v33 }
 0x545   : > { %1279 = vmatpush.msrb.mxu2 %v1247_v38 }
 0x559   : > { %v1101_v42 = vpop.f32.mrf.mxu2 }
 0x55a   : > { %v1105_v43 = vpack.c.bf16 %v1101_v42, %v1101_v42 }
 0x55c   : > { %1965 = vmatmul.msk.bf16.vlgmr.msra.gmra.mxu2 %vm857_vm12, %v1105_v43 }
 0x55d   : > { %1471 = vmatpush.bf16.msra.mxu2 %v1462_v60 }
 0x561   : > { %v1239_v39 = vpop.xlane.xlu0 %1238 }
 0x569   : > { %v1397_v45 = vpop.xlane.xlu1 %1396 }
 0x56a   : > { %2210 = vrcp.f32 %v1397_v45 }
 0x56b   : > { %2212 = vrcp.f32 %v1239_v39 }
 0x56c   : > { %1974 = vmatmul.msk.f32.vlgmr.msrb.gmra.mxu2 %vm896_vm13, %v1243_v47 }
 0x570   : > { %v2211_v50 = vpop.eup %2210 }
 0x571   : > { %v1405_v51 = vmul.f32 %v2211_v50, %v2201_v11  ;;  %v2213_v54 = vpop.eup %2212 }
 0x572   : > { %v1245_v53 = vmul.f32 %v2213_v54, %v2717_v8 }
 0x573   : > { %1987 = vmatmul.msk.f32.gmra.mxu1 %vm896_vm13, %v1405_v51 }
 0x574   : > { %1975 = vmatmul.msk.f32.gmra.mxu2 %vm896_vm13, %v1244_v46 }
 0x57c   : > { %1976 = vmatmul.msk.f32.gmra.mxu2 %vm896_vm13, %v1245_v53 }
 0x592   : > { %v1154_v48 = vpop.f32.mrf.mxu1 }
 0x59a   : > { %v1156_v55 = vpop.f32.mrf.mxu1 }
 0x5a0   : > { %v1127_v1 = vpop.f32.mrf.mxu0 }
 0x5a1   : > { %v1155_v5 = vadd.f32 %v1154_v48, %v1127_v1  ;;  %v2065_v48 = vld [vmem:[%s2877_s7 + $0x8] sm:$0xff]  ;;  %v2156_v1 = vld [vmem:[%s2884_s14] ss:$0 sm:$0xff] }
 0x5a2   : > { %v1159_v56 = vpop.f32.mrf.mxu1  ;;  %1602 = vmatpush.bf16.msra.mxu3 %v2065_v48 }
 0x5a6   : > { %v1400_v57 = vpop.xlane.xlu2 %1399 }
 0x5a7   : > { %2214 = vrcp.f32 %v1400_v57 }
 0x5a8   : > { %v1129_v61 = vpop.f32.mrf.mxu0 }
 0x5a9   : > { %v1157_v21 = vadd.f32 %v1156_v55, %v1129_v61 }
 0x5aa   : > { %v1161_v58 = vpop.f32.mrf.mxu1 }
 0x5ab   : > { %v2064_v58 = vld [vmem:[%s2877_s7] sm:$0xff] }
 0x5ac   : > { %1603 = vmatpush.bf16.msra.mxu3 %v2064_v58 }
 0x5ad   : > { %v2215_v59 = vpop.eup %2214 }
 0x5ae   : > { %v1406_v9 = vmul.f32 %v2215_v59, %v2205_v31 }
 0x5b0   : > { %1988 = vmatmul.msk.f32.gmra.mxu1 %vm896_vm13, %v1406_v9 }
 0x5b2   : > { %v1442_v4 = vpop.f32.mrf.mxu1 }
 0x5df   : > { %v1132_v0 = vpop.f32.mrf.mxu2 }
 0x5e0   : > { %v1160_v2 = vadd.f32 %v1159_v56, %v1132_v0 }
 0x5e7   : > { %v1134_v3 = vpop.f32.mrf.mxu2 }
 0x5ef   : > { %v1281_v6 = vpop.f32.mrf.mxu2 }
 0x5f0   : > { %v1445_v7 = vpop.f32.mrf.mxu1 }
 0x5f1   : > { %v1451_v41 = vpack.c.bf16 %v1445_v7, %v1442_v4 }
 0x5f3   : > { %1990 = vmatmul.msk.bf16.vlgmr.msra.gmra.mxu2 %vm857_vm12, %v1451_v41 }
 0x5f7   : > { %v1284_v16 = vpop.f32.mrf.mxu2 }
 0x5f8   : > { %v1290_v8 = vpack.c.bf16 %v1284_v16, %v1281_v6 }
 0x5fa   : > { %1978 = vmatmul.msk.bf16.vlgmr.msra.gmra.mxu0 %vm857_vm12, %v1290_v8 }
 0x5ff   : > { %v1287_v10 = vpop.f32.mrf.mxu2 }
 0x600   : > { %v1291_v11 = vpack.c.bf16 %v1287_v10, %v1287_v10  ;;  %v2155_v10 = vld [vmem:[%s2883_s13] ss:$0 sm:$0xff] }
 0x60a   : > { %1979 = vmatmul.msk.bf16.gmra.mxu0 %vm857_vm12, %v1291_v11 }
 0x62d   : > { %v1448_v13 = vpop.f32.mrf.mxu1 }
 0x62e   : > { %v1452_v12 = vpack.c.bf16 %v1448_v13, %v1448_v13 }
 0x630   : > { %1991 = vmatmul.msk.bf16.gmra.mxu2 %vm857_vm12, %v1452_v12 }
 0x676   : > { %v1473_v14 = vpop.f32.mrf.mxu2 }
 0x677   : > { %v1312_v15 = vpop.f32.mrf.mxu0 }
 0x678   : > { %v1321_v17 = vadd.f32 %v1312_v15, %v1155_v5 }
 0x67a   : > { %v1482_v18 = vadd.f32 %v1473_v14, %v1321_v17 }
 0x67c   : > { %v2754_v20 = vadd.f32 %v1482_v18, %v2497_v30 }
 0x67e   : > { %v1490_v23 = vsel %vm708_vm0, %v2754_v20, 0.0  ;;  %v1475_v25 = vpop.f32.mrf.mxu2 }
 0x67f   : > { %v1314_v22 = vpop.f32.mrf.mxu0  ;;  %1491 = vadd.xlane.f32.xlu1 %v1490_v23 }
 0x680   : > { %v1322_v24 = vadd.f32 %v1314_v22, %v1157_v21 }
 0x682   : > { %v1483_v26 = vadd.f32 %v1475_v25, %v1322_v24 }
 0x684   : > { %v2759_v27 = vadd.f32 %v1483_v26, %v2502_v32 }
 0x686   : > { %v1493_v28 = vsel %vm708_vm0, %v2759_v27, 0.0 }
 0x687   : > { %1494 = vadd.xlane.f32.xlu1 %v1493_v28  ;;  %v1317_v29 = vpop.f32.mrf.mxu0 }
 0x688   : > { %v1323_v30 = vadd.f32 %v1317_v29, %v1160_v2 }
 0x68f   : > { %v1319_v31 = vpop.f32.mrf.mxu0 }
 0x6b3   : > { %v1478_v34 = vpop.f32.mrf.mxu2 }
 0x6b4   : > { %v1484_v35 = vadd.f32 %v1478_v34, %v1323_v30 }
 0x6b6   : > { %v2764_v36 = vadd.f32 %v1484_v35, %v2489_v19 }
 0x6b8   : > { %v1496_v37 = vsel %vm708_vm0, %v2764_v36, 0.0 }
 0x6b9   : > { %1497 = vadd.xlane.f32.xlu0 %v1496_v37 }
 0x6bb   : > { %v1480_v33 = vpop.f32.mrf.mxu2 }
 0x6f2   : > { %v1492_v38 = vpop.xlane.xlu1 %1491 }
 0x6f3   : > { %v1499_v32 = vmul.f32 %v1492_v38, %v2506_v40  ;;  %v2072_v38 = vld [vmem:[%s2879_s9 + $0x30] sm:$0xff] }
 0x6f5   : > { %v1502_v42 = vsub.f32 %v2754_v20, %v1499_v32  ;;  %v2071_v32 = vld [vmem:[%s2879_s9 + $0x28] sm:$0xff] }
 0x6f7   : > { %v1505_v43 = vmul.f32 %v1502_v42, %v1502_v42 }
 0x6f9   : > { %v1508_v44 = vsel %vm708_vm0, %v1505_v43, 0.0  ;;  %v2069_v43 = vld [vmem:[%s2879_s9 + $0x18] sm:$0xff] }
 0x6fa   : > { %1509 = vadd.xlane.f32.xlu2 %v1508_v44  ;;  %v1495_v45 = vpop.xlane.xlu1 %1494  ;;  %v2068_v44 = vld [vmem:[%s2879_s9 + $0x10] sm:$0xff] }
 0x6fb   : > { %v1500_v47 = vmul.f32 %v1495_v45, %v2506_v40  ;;  %v2067_v45 = vld [vmem:[%s2879_s9 + $0x8] sm:$0xff] }
 0x6fd   : > { %v1503_v19 = vsub.f32 %v2759_v27, %v1500_v47  ;;  %v2157_v47 = vld [vmem:[%s2878_s8] ss:$0 sm:$0xff] }
 0x6ff   : > { %v1506_v39 = vmul.f32 %v1503_v19, %v1503_v19 }
 0x701   : > { %v1511_v49 = vsel %vm708_vm0, %v1506_v39, 0.0  ;;  %v2066_v39 = vld [vmem:[%s2879_s9] sm:$0xff] }
 0x702   : > { %1512 = vadd.xlane.f32.xlu1 %v1511_v49 }
 0x72c   : > { %v1498_v50 = vpop.xlane.xlu0 %1497 }
 0x72d   : > { %v1501_v51 = vmul.f32 %v1498_v50, %v2506_v40 }
 0x72f   : > { %v1504_v46 = vsub.f32 %v2764_v36, %v1501_v51 }
 0x731   : > { %v1507_v54 = vmul.f32 %v1504_v46, %v1504_v46 }
 0x733   : > { %v1514_v53 = vsel %vm708_vm0, %v1507_v54, 0.0 }
 0x734   : > { %1515 = vadd.xlane.f32.xlu0 %v1514_v53 }
 0x76d   : > { %v1510_v55 = vpop.xlane.xlu2 %1509 }
 0x76e   : > { %v1517_v56 = vmul.f32 %v1510_v55, %v2506_v40 }
 0x770   : > { %v1520_v57 = vadd.f32 1e-05, %v1517_v56 }
 0x772   : > { %2216 = vrsqrt.f32 %v1520_v57  ;;  %vm1529_vm1 = vweird.f32 %v1520_v57 }
 0x775   : > { %v1513_v59 = vpop.xlane.xlu1 %1512 }
 0x776   : > { %v1518_v9 = vmul.f32 %v1513_v59, %v2506_v40 }
 0x778   : > { %v2217_v52 = vpop.eup %2216  ;;  %v1521_v60 = vadd.f32 1e-05, %v1518_v9 }
 0x779   : > { %v1524_v62 = vmul.f32 %v2217_v52, %v1520_v57  ;;  %vm1530_vm15 = vweird.f32 %v2217_v52 }
 0x77a   : > { %2218 = vrsqrt.f32 %v1521_v60  ;;  %vm1531_vm2 = vmor %vm1529_vm1, %vm1530_vm15  ;;  %vm1539_vm4 = vweird.f32 %v1521_v60 }
 0x77b   : > { %v1525_v63 = vmul.f32 %v2217_v52, %v1524_v62 }
 0x77d   : > { %v1526_v0 = vmul.f32 0.5, %v1525_v63 }
 0x77f   : > { %v1527_v2 = vsub.f32 1.5, %v1526_v0 }
 0x780   : > { %v2219_v3 = vpop.eup %2218 }
 0x781   : > { %v1528_v4 = vmul.f32 %v2217_v52, %v1527_v2  ;;  %v1534_v6 = vmul.f32 %v2219_v3, %v1521_v60  ;;  %vm1540_vm3 = vweird.f32 %v2219_v3 }
 0x782   : > { %vm1541_vm5 = vmor %vm1539_vm4, %vm1540_vm3 }
 0x783   : > { %v1535_v7 = vmul.f32 %v2219_v3, %v1534_v6  ;;  %v1532_v41 = vsel %vm1531_vm2, %v2217_v52, %v1528_v4 }
 0x784   : > { %v1553_v11 = vmul.f32 %v1532_v41, %v1502_v42  ;;  %v2070_v42 = vld [vmem:[%s2879_s9 + $0x20] sm:$0xff] }
 0x785   : > { %v1536_v16 = vmul.f32 0.5, %v1535_v7 }
 0x786   : > { %v1559_v61 = vmul.f32 %v2155_v10, %v1553_v11 }
 0x787   : > { %v1537_v8 = vsub.f32 1.5, %v1536_v16 }
 0x788   : > { %v1565_v15 = vadd.f32 %v2156_v1, %v1559_v61 }
 0x789   : > { %v1538_v13 = vmul.f32 %v2219_v3, %v1537_v8 }
 0x78b   : > { %v1542_v12 = vsel %vm1541_vm5, %v2219_v3, %v1538_v13 }
 0x78c   : > { %v1554_v5 = vmul.f32 %v1542_v12, %v1503_v19 }
 0x78e   : > { %v1560_v14 = vmul.f32 %v2155_v10, %v1554_v5 }
 0x790   : > { %v1566_v17 = vadd.f32 %v2156_v1, %v1560_v14 }
 0x792   : > { %v1568_v18 = vpack.c.bf16 %v1566_v17, %v1565_v15  ;;  %v2075_v17 = vld [vmem:[%s2885_s15 + $0x8] sm:$0xff] }
 0x793   : > { %1766 = vmatpush.bf16.msra.mxu1 %v2075_v17 }
 0x794   : > { %2000 = vmatmul.msk.bf16.vlgmr.msra.gmra.mxu3 %vm708_vm0, %v1568_v18  ;;  %v2074_v18 = vld [vmem:[%s2885_s15] sm:$0xff] }
 0x797   : > { %1767 = vmatpush.bf16.msra.mxu1 %v2074_v18 }
 0x7a7   : > { %v1516_v21 = vpop.xlane.xlu0 %1515 }
 0x7a8   : > { %v1519_v23 = vmul.f32 %v1516_v21, %v2506_v40  ;;  %v2073_v40 = vld [vmem:[%s2879_s9 + $0x38] sm:$0xff] }
 0x7a9   : > { %1711 = vmatpush.bf16.msrb.mxu0 %v2073_v40 }
 0x7aa   : > { %v1522_v22 = vadd.f32 1e-05, %v1519_v23  ;;  %v2158_v23 = vld [vmem:[%s2880_s10] ss:$0 sm:$0xff] }
 0x7ac   : > { %2220 = vrsqrt.f32 %v1522_v22  ;;  %vm1549_vm7 = vweird.f32 %v1522_v22 }
 0x7ad   : > { %1712 = vmatpush.bf16.msrb.mxu0 %v2072_v38 }
 0x7b1   : > { %1713 = vmatpush.bf16.msrb.mxu0 %v2071_v32 }
 0x7b2   : > { %v2221_v24 = vpop.eup %2220 }
 0x7b3   : > { %v1544_v25 = vmul.f32 %v2221_v24, %v1522_v22  ;;  %vm1550_vm6 = vweird.f32 %v2221_v24 }
 0x7b4   : > { %vm1551_vm8 = vmor %vm1549_vm7, %vm1550_vm6 }
 0x7b5   : > { %v1545_v26 = vmul.f32 %v2221_v24, %v1544_v25  ;;  %1714 = vmatpush.bf16.msrb.mxu0 %v2070_v42 }
 0x7b7   : > { %v1546_v28 = vmul.f32 0.5, %v1545_v26 }
 0x7b9   : > { %v1547_v29 = vsub.f32 1.5, %v1546_v28  ;;  %1715 = vmatpush.bf16.msrb.mxu0 %v2069_v43 }
 0x7bb   : > { %v1548_v31 = vmul.f32 %v2221_v24, %v1547_v29 }
 0x7bd   : > { %v1552_v30 = vsel %vm1551_vm8, %v2221_v24, %v1548_v31  ;;  %1716 = vmatpush.bf16.msrb.mxu0 %v2068_v44 }
 0x7be   : > { %v1555_v34 = vmul.f32 %v1552_v30, %v1504_v46 }
 0x7c0   : > { %v1561_v35 = vmul.f32 %v2155_v10, %v1555_v34 }
 0x7c1   : > { %1717 = vmatpush.bf16.msrb.mxu0 %v2067_v45 }
 0x7c2   : > { %v1567_v37 = vadd.f32 %v2156_v1, %v1561_v35 }
 0x7c4   : > { %v1569_v33 = vpack.c.bf16 %v1567_v37, %v1567_v37 }
 0x7c5   : > { %1718 = vmatpush.bf16.msrb.mxu0 %v2066_v39 }
 0x7c6   : > { %2001 = vmatmul.msk.bf16.gmra.mxu3 %vm708_vm0, %v1569_v33 }
 0x817   : > { %v1605_v19 = vpop.f32.mrf.mxu3 }
 0x818   : > { %v1606_v49 = vadd.f32 %v2157_v47, %v1605_v19 }
 0x81a   : > { %v1614_v50 = vmul.f32 %v1606_v49, %v1606_v49 }
 0x81c   : > { %v1617_v51 = vmul.f32 %v1614_v50, %v1606_v49 }
 0x81e   : > { %v1620_v46 = vmul.f32 0.044715, %v1617_v51 }
 0x81f   : > { %v1607_v54 = vpop.f32.mrf.mxu3 }
 0x820   : > { %v1623_v53 = vadd.f32 %v1620_v46, %v1606_v49  ;;  %v1608_v48 = vadd.f32 %v2157_v47, %v1607_v54 }
 0x822   : > { %v1626_v55 = vmul.f32 0.7978846, %v1623_v53  ;;  %v1615_v56 = vmul.f32 %v1608_v48, %v1608_v48 }
 0x824   : > { %v1618_v57 = vmul.f32 %v1615_v56, %v1608_v48  ;;  %2222 = vtanh.f32 %v1626_v55 }
 0x826   : > { %v1621_v58 = vmul.f32 0.044715, %v1618_v57 }
 0x828   : > { %v1624_v59 = vadd.f32 %v1621_v58, %v1608_v48 }
 0x82a   : > { %v1627_v9 = vmul.f32 0.7978846, %v1624_v59  ;;  %v2223_v52 = vpop.eup %2222 }
 0x82b   : > { %v1632_v60 = vadd.f32 1.0, %v2223_v52 }
 0x82c   : > { %2224 = vtanh.f32 %v1627_v9 }
 0x82d   : > { %v1635_v63 = vmul.f32 0.5, %v1632_v60 }
 0x82f   : > { %v1638_v3 = vmul.f32 %v1635_v63, %v1606_v49 }
 0x832   : > { %v2225_v62 = vpop.eup %2224 }
 0x833   : > { %v1633_v0 = vadd.f32 1.0, %v2225_v62 }
 0x835   : > { %v1636_v2 = vmul.f32 0.5, %v1633_v0 }
 0x837   : > { %v1639_v4 = vmul.f32 %v1636_v2, %v1608_v48 }
 0x839   : > { %v1641_v6 = vpack.c.bf16 %v1639_v4, %v1638_v3 }
 0x83b   : > { %1719 = vmatmul.bf16.vlgmr.msrb.gmra.mxu0 %v1641_v6 }
 0x849   : > { %v1610_v7 = vpop.f32.mrf.mxu3 }
 0x84a   : > { %v1611_v41 = vadd.f32 %v2157_v47, %v1610_v7 }
 0x84c   : > { %v1616_v16 = vmul.f32 %v1611_v41, %v1611_v41 }
 0x84e   : > { %v1619_v8 = vmul.f32 %v1616_v16, %v1611_v41 }
 0x850   : > { %v1622_v10 = vmul.f32 0.044715, %v1619_v8 }
 0x851   : > { %v1612_v11 = vpop.f32.mrf.mxu3 }
 0x852   : > { %v1625_v13 = vadd.f32 %v1622_v10, %v1611_v41 }
 0x854   : > { %v1628_v12 = vmul.f32 0.7978846, %v1625_v13 }
 0x856   : > { %2226 = vtanh.f32 %v1628_v12 }
 0x85c   : > { %v2227_v1 = vpop.eup %2226 }
 0x85d   : > { %v1634_v61 = vadd.f32 1.0, %v2227_v1 }
 0x85f   : > { %v1637_v5 = vmul.f32 0.5, %v1634_v61 }
 0x861   : > { %v1640_v14 = vmul.f32 %v1637_v5, %v1611_v41 }
 0x863   : > { %v1642_v15 = vpack.c.bf16 %v1640_v14, %v1640_v14 }
 0x865   : > { %1724 = vmatmul.bf16.gmra.mxu0 %v1642_v15 }
 0x8b8   : > { %v1720_v21 = vpop.f32.mrf.mxu0 }
 0x8b9   : > { %v1721_v22 = vadd.f32 %v2158_v23, %v1720_v21 }
 0x8bb   : > { %v1729_v26 = vadd.f32 %v1721_v22, %v2754_v20  ;;  %v2159_v20 = vld [vmem:[%s2886_s16] ss:$0 sm:$0xff] }
 0x8c0   : > { %v1722_v24 = vpop.f32.mrf.mxu0 }
 0x8c1   : > { %v1723_v25 = vadd.f32 %v2158_v23, %v1722_v24 }
 0x8c3   : > { %v1730_v28 = vadd.f32 %v1723_v25, %v2759_v27 }
 0x8c5   : > { %v1732_v29 = vpack.c.bf16 %v1730_v28, %v1729_v26 }
 0x8c7   : > { %2042 = vmatmul.msk.bf16.vlgmr.msra.gmra.mxu1 %vm708_vm0, %v1732_v29 }
 0x8e2   : > { %v1725_v31 = vpop.f32.mrf.mxu0 }
 0x8e3   : > { %v1726_v30 = vadd.f32 %v2158_v23, %v1725_v31 }
 0x8e5   : > { %v1731_v34 = vadd.f32 %v1726_v30, %v2764_v36 }
 0x8e7   : > { %v1733_v35 = vpack.c.bf16 %v1731_v34, %v1731_v34 }
 0x8e9   : > { %2043 = vmatmul.msk.bf16.gmra.mxu1 %vm708_vm0, %v1733_v35 }
 0x8ea   : > { %v1727_v37 = vpop.f32.mrf.mxu0 }
 0x944   : > { %v1769_v33 = vpop.f32.mrf.mxu1 }
 0x945   : > { %v1770_v27 = vadd.f32 %v2159_v20, %v1769_v33 }
 0x947   : > { %1778 = vst [vmem:[%s554_s24] sm:$0xff] %v1770_v27 }
 0x94c   : > { %v1771_v40 = vpop.f32.mrf.mxu1 }
 0x94d   : > { %v1772_v38 = vadd.f32 %v2159_v20, %v1771_v40 }
 0x94f   : > { %1779 = vst [vmem:[%s554_s24 + $0x8] sm:$0xff] %v1772_v38 }
 0x966   : > { %v1774_v36 = vpop.f32.mrf.mxu1 }
 0x967   : > { %v1775_v32 = vadd.f32 %v2159_v20, %v1774_v36 }
 0x969   : > { %1780 = vst [vmem:[%s554_s24 + $0x10] sm:$0xff] %v1775_v32 }
 0x96a   : > { %2255 = shalt.err (!%p2252_p3)
}
 0x96b   : > { %s2304_s18 = smov 128   ;;  %s2305_s24 = smov 8  }
 0x96c   : > { %2079 = dma.vmem_to_hbm [thread:$0]  (%p2434_p5), %s1795_s21, 384, %s1797_s29, %s1782_s30, %s2304_s18, %s2304_s18, %s2305_s24  }
 0x96e   : > { %v1776_v42 = vpop.f32.mrf.mxu1 }
 0x96f PF: > { %s2917_s23 = sld [smem:[#allocation8_spill]] }
 0x970   : > { %s2918_s2 = sld [smem:[#allocation6_spill]] }
 0x975   : > { %p2085_p4 = scmp.ge.s32.totalorder %s2917_s23, 2 }
 0x976   : > { %s1811_s28 = sand.u32 1, %s2918_s2  }
 0x977   : > { %p2082_p7 = pnand %p2085_p4, %p2438_p6  ;;  %s1812_s0 = scalar_lea.sflag [#allocation4], %s1811_s28 }
 0x979   : > { %p2083_p8 = pneg %p2082_p7 }
 0x97b   : > { %2273 = dma.done.wait (%p2083_p8), %s1812_s0, 384  }
 0x97c   : > { %2275 = vsyncadd (%p2083_p8), %s1812_s0, 4294966912  ;;  %s2920_s27 = sld [smem:[#allocation9_spill]]  ;;  %s2923_s24 = smov %s2282_s25 }
 0x97d   : > { %s2921_s26 = sld [smem:[#allocation7_spill]] }
 0x97e   : > { %s2922_s19 = sld [smem:[#allocation10_spill]] }
 0x982   : > { %p27_p9 = scmp.ge.s32.totalorder %s2920_s27, 4  }
 0x983   : > { %s2924_s25 = smov %s2921_s26 }
 0x984   : > { %s2925_s26 = smov %s2922_s19  ;;  %29 = sbr.rel (!%p27_p9) target bundleno = 9 (0x9), region = 129 }
 0x989   :  { %1818 = vsyncpa [#allocation4], 1 }
 0x98a   :  { %1820 = vsyncpa [#allocation4 + $0x1], 1 }

</bundles_post_ra>
